<compile_context>
chip_gen: v5e
topology: v5e:2x2
jax: 0.10.0
libtpu: 0.0.40
codegen_flags: <defaults>
</compile_context>

<pallas_src>
import jax
import jax.numpy as jnp
from jax.experimental import pallas as pl
from jax.experimental.pallas import tpu as pltpu

# Small synthetic config (a "transformer.config.hidden_size" of 32).
B, S, H, NH, FF = 2, 8, 32, 4, 64
HD = H // NH
VOCAB = 50
OUT_DIM = 10
N_LAYERS = 2
LN_EPS = 1e-12


def _layer_norm(x, g, b):
    mu = jnp.mean(x, axis=-1, keepdims=True)
    var = jnp.mean((x - mu) ** 2, axis=-1, keepdims=True)
    return (x - mu) * jax.lax.rsqrt(var + LN_EPS) * g + b


def _gelu(x):
    # tanh-approx GELU (EUP-friendly)
    c = 0.7978845608028654  # sqrt(2/pi)
    return 0.5 * x * (1.0 + jnp.tanh(c * (x + 0.044715 * x * x * x)))


def fused_transformer_kernel(
        x_ref, emb_g_ref, emb_b_ref,
        wqkv_ref, bqkv_ref, wo_ref, bo_ref,
        g1_ref, b1_ref, w1_ref, bf1_ref, w2_ref, bf2_ref, g2_ref, b2_ref,
        fcw_ref, fcb_ref, out_ref):
    """Embedding LN + N_LAYERS post-LN encoder layers + tanh/fc head, fused."""
    scale = 1.0 / (HD ** 0.5)

    # Embedding LayerNorm on the flattened, lane-dense [B*S, H] slab.
    x = _layer_norm(x_ref[...].reshape(B * S, H), emb_g_ref[...], emb_b_ref[...])

    # TODO(synk): no attention / key-padding mask (reference encoder called
    # without a mask); add one here if the HF model uses src_key_padding_mask.
    for l in range(N_LAYERS):                       # static 2-iteration loop
        # ---- fused QKV projection: one [B*S, H] x [H, 3H] matmul ----
        qkv = (jnp.dot(x, wqkv_ref[l], preferred_element_type=jnp.float32)
               + bqkv_ref[l])                       # [B*S, 3H]
        q = qkv[:, 0 * H:1 * H].reshape(B, S, H)
        k = qkv[:, 1 * H:2 * H].reshape(B, S, H)
        v = qkv[:, 2 * H:3 * H].reshape(B, S, H)

        # ---- attention: batched over B, static loop over heads ----
        ctx_heads = []
        for h in range(NH):
            sl = slice(h * HD, (h + 1) * HD)
            qh, kh, vh = q[:, :, sl], k[:, :, sl], v[:, :, sl]   # [B, S, HD]
            s = jnp.einsum('bqd,bkd->bqk', qh, kh,
                           preferred_element_type=jnp.float32) * scale
            s = s - jnp.max(s, axis=-1, keepdims=True)
            p = jnp.exp(s)
            p = p * pl.reciprocal(jnp.sum(p, axis=-1, keepdims=True),
                                  approx=True)
            ctx_heads.append(jnp.einsum('bqk,bkd->bqd', p, vh,
                                        preferred_element_type=jnp.float32))
        ctx = jnp.concatenate(ctx_heads, axis=-1).reshape(B * S, H)

        # ---- single output projection + residual + LN ----
        attn = (jnp.dot(ctx, wo_ref[l], preferred_element_type=jnp.float32)
                + bo_ref[l])
        x = _layer_norm(x + attn, g1_ref[l], b1_ref[l])

        # ---- FFN on the whole [B*S, H] slab ----
        hmid = _gelu(jnp.dot(x, w1_ref[l],
                             preferred_element_type=jnp.float32) + bf1_ref[l])
        ffn = (jnp.dot(hmid, w2_ref[l], preferred_element_type=jnp.float32)
               + bf2_ref[l])
        x = _layer_norm(x + ffn, g2_ref[l], b2_ref[l])

    # ---- head: last_hidden_state[:, 0, :] -> tanh -> Linear(H, OUT_DIM) ----
    cls = x.reshape(B, S, H)[:, 0, :]               # [B, H]
    out_ref[...] = (jnp.dot(jnp.tanh(cls), fcw_ref[...],
                            preferred_element_type=jnp.float32)
                    + fcb_ref[...])


def _vmem_specs(n):
    return [pl.BlockSpec(memory_space=pltpu.MemorySpace.VMEM) for _ in range(n)]


def transformer_forward(input_ids, params):
    # Glue: embedding gather (+ position) in plain JAX; everything else fused.
    x = params["word_emb"][input_ids] + params["pos_emb"][None, :, :]
    x = x.astype(jnp.float32)
    args = (x, params["emb_g"], params["emb_b"],
            params["wqkv"], params["bqkv"], params["wo"], params["bo"],
            params["g1"], params["b1"], params["w1"], params["bf1"],
            params["w2"], params["bf2"], params["g2"], params["b2"],
            params["fc_w"], params["fc_b"])
    return pl.pallas_call(
        fused_transformer_kernel,
        out_shape=jax.ShapeDtypeStruct((B, OUT_DIM), jnp.float32),
        in_specs=_vmem_specs(len(args)),
        out_specs=pl.BlockSpec(memory_space=pltpu.MemorySpace.VMEM),
    )(*args)


def init_params(key):
    def nrm(k, shape):
        return (0.02 * jax.random.normal(k, shape)).astype(jnp.float32)

    keys = iter(jax.random.split(key, 16))
    return {
        "word_emb": nrm(next(keys), (VOCAB, H)),
        "pos_emb": nrm(next(keys), (S, H)),
        "emb_g": jnp.ones((1, H), jnp.float32),
        "emb_b": jnp.zeros((1, H), jnp.float32),
        # Per-layer weights stacked along a leading [N_LAYERS, ...] axis.
        "wqkv": nrm(next(keys), (N_LAYERS, H, 3 * H)),       # Wq|Wk|Wv fused
        "bqkv": jnp.zeros((N_LAYERS, 1, 3 * H), jnp.float32),
        "wo": nrm(next(keys), (N_LAYERS, H, H)),
        "bo": jnp.zeros((N_LAYERS, 1, H), jnp.float32),
        "g1": jnp.ones((N_LAYERS, 1, H), jnp.float32),
        "b1": jnp.zeros((N_LAYERS, 1, H), jnp.float32),
        "w1": nrm(next(keys), (N_LAYERS, H, FF)),
        "bf1": jnp.zeros((N_LAYERS, 1, FF), jnp.float32),
        "w2": nrm(next(keys), (N_LAYERS, FF, H)),
        "bf2": jnp.zeros((N_LAYERS, 1, H), jnp.float32),
        "g2": jnp.ones((N_LAYERS, 1, H), jnp.float32),
        "b2": jnp.zeros((N_LAYERS, 1, H), jnp.float32),
        "fc_w": nrm(next(keys), (H, OUT_DIM)),
        "fc_b": jnp.zeros((1, OUT_DIM), jnp.float32),
    }


if __name__ == "__main__":
    root = jax.random.PRNGKey(0)
    k_data, k_params = jax.random.split(root)
    input_ids = jax.random.randint(k_data, (B, S), 0, VOCAB, dtype=jnp.int32)
    params = init_params(k_params)

    out = jax.jit(transformer_forward)(input_ids, params)
    out = jax.block_until_ready(out)
    assert out.shape == (B, OUT_DIM) and out.dtype == jnp.float32
    print("KERNEL_OK")
</pallas_src>

<mosaic_0001>
module attributes {stable_mosaic.version = 11 : i64} {
  func.func @fused_transformer_kernel(%arg0: memref<2x8x32xf32, #tpu.memory_space<vmem>>, %arg1: memref<1x32xf32, #tpu.memory_space<vmem>>, %arg2: memref<1x32xf32, #tpu.memory_space<vmem>>, %arg3: memref<2x32x96xf32, #tpu.memory_space<vmem>>, %arg4: memref<2x1x96xf32, #tpu.memory_space<vmem>>, %arg5: memref<2x32x32xf32, #tpu.memory_space<vmem>>, %arg6: memref<2x1x32xf32, #tpu.memory_space<vmem>>, %arg7: memref<2x1x32xf32, #tpu.memory_space<vmem>>, %arg8: memref<2x1x32xf32, #tpu.memory_space<vmem>>, %arg9: memref<2x32x64xf32, #tpu.memory_space<vmem>>, %arg10: memref<2x1x64xf32, #tpu.memory_space<vmem>>, %arg11: memref<2x64x32xf32, #tpu.memory_space<vmem>>, %arg12: memref<2x1x32xf32, #tpu.memory_space<vmem>>, %arg13: memref<2x1x32xf32, #tpu.memory_space<vmem>>, %arg14: memref<2x1x32xf32, #tpu.memory_space<vmem>>, %arg15: memref<32x10xf32, #tpu.memory_space<vmem>>, %arg16: memref<1x10xf32, #tpu.memory_space<vmem>>, %arg17: memref<2x10xf32, #tpu.memory_space<vmem>>) attributes {dimension_semantics = [], scalar_prefetch = 0 : i64, scratch_operands = 0 : i64, tpu.core_type = #tpu.core_type<tc>} {
    %c0 = arith.constant 0 : index
    %c0_0 = arith.constant 0 : index
    %c0_1 = arith.constant 0 : index
    %0 = vector.load %arg0[%c0, %c0_0, %c0_1] : memref<2x8x32xf32, #tpu.memory_space<vmem>>, vector<2x8x32xf32>
    %1 = vector.shape_cast %0 : vector<2x8x32xf32> to vector<16x32xf32>
    %c0_2 = arith.constant 0 : index
    %c0_3 = arith.constant 0 : index
    %2 = vector.load %arg1[%c0_2, %c0_3] : memref<1x32xf32, #tpu.memory_space<vmem>>, vector<1x32xf32>
    %c0_4 = arith.constant 0 : index
    %c0_5 = arith.constant 0 : index
    %3 = vector.load %arg2[%c0_4, %c0_5] : memref<1x32xf32, #tpu.memory_space<vmem>>, vector<1x32xf32>
    %cst = arith.constant dense<0.000000e+00> : vector<16xf32>
    %4 = vector.multi_reduction <add>, %1, %cst [1] : vector<16x32xf32> to vector<16xf32>
    %5 = vector.shape_cast %4 : vector<16xf32> to vector<16x1xf32>
    %cst_6 = arith.constant 3.200000e+01 : f32
    %6 = vector.broadcast %cst_6 : f32 to vector<16x1xf32>
    %7 = arith.divf %5, %6 : vector<16x1xf32>
    %8 = vector.broadcast %7 : vector<16x1xf32> to vector<16x32xf32>
    %9 = arith.subf %1, %8 : vector<16x32xf32>
    %10 = arith.mulf %9, %9 : vector<16x32xf32>
    %cst_7 = arith.constant dense<0.000000e+00> : vector<16xf32>
    %11 = vector.multi_reduction <add>, %10, %cst_7 [1] : vector<16x32xf32> to vector<16xf32>
    %12 = vector.shape_cast %11 : vector<16xf32> to vector<16x1xf32>
    %cst_8 = arith.constant 3.200000e+01 : f32
    %13 = vector.broadcast %cst_8 : f32 to vector<16x1xf32>
    %14 = arith.divf %12, %13 : vector<16x1xf32>
    %15 = vector.broadcast %7 : vector<16x1xf32> to vector<16x32xf32>
    %16 = arith.subf %1, %15 : vector<16x32xf32>
    %cst_9 = arith.constant 9.99999996E-13 : f32
    %17 = vector.broadcast %cst_9 : f32 to vector<16x1xf32>
    %18 = arith.addf %14, %17 : vector<16x1xf32>
    %19 = math.rsqrt %18 : vector<16x1xf32>
    %20 = vector.broadcast %19 : vector<16x1xf32> to vector<16x32xf32>
    %21 = arith.mulf %16, %20 : vector<16x32xf32>
    %22 = vector.broadcast %2 : vector<1x32xf32> to vector<16x32xf32>
    %23 = arith.mulf %21, %22 : vector<16x32xf32>
    %24 = vector.broadcast %3 : vector<1x32xf32> to vector<16x32xf32>
    %25 = arith.addf %23, %24 : vector<16x32xf32>
    %c0_10 = arith.constant 0 : index
    %c0_11 = arith.constant 0 : index
    %c0_12 = arith.constant 0 : index
    %26 = vector.load %arg3[%c0_10, %c0_11, %c0_12] : memref<2x32x96xf32, #tpu.memory_space<vmem>>, vector<1x32x96xf32>
    %27 = vector.shape_cast %26 : vector<1x32x96xf32> to vector<32x96xf32>
    %cst_13 = arith.constant dense<0.000000e+00> : vector<16x96xf32>
    %28 = tpu.matmul %25, %27, %cst_13 {dimension_numbers = #tpu.dot_dimension_numbers<[1], [0], [0], [1], [0, 0, 1, 1], [], []>} : vector<16x32xf32>, vector<32x96xf32>, vector<16x96xf32> -> vector<16x96xf32>
    %c0_14 = arith.constant 0 : index
    %c0_15 = arith.constant 0 : index
    %c0_16 = arith.constant 0 : index
    %29 = vector.load %arg4[%c0_14, %c0_15, %c0_16] : memref<2x1x96xf32, #tpu.memory_space<vmem>>, vector<1x1x96xf32>
    %30 = vector.shape_cast %29 : vector<1x1x96xf32> to vector<1x96xf32>
    %31 = vector.broadcast %30 : vector<1x96xf32> to vector<16x96xf32>
    %32 = arith.addf %28, %31 : vector<16x96xf32>
    %33 = vector.extract_strided_slice %32 {offsets = [0, 0], sizes = [16, 32], strides = [1, 1]} : vector<16x96xf32> to vector<16x32xf32>
    %34 = vector.shape_cast %33 : vector<16x32xf32> to vector<2x8x32xf32>
    %35 = vector.extract_strided_slice %32 {offsets = [0, 32], sizes = [16, 32], strides = [1, 1]} : vector<16x96xf32> to vector<16x32xf32>
    %36 = vector.shape_cast %35 : vector<16x32xf32> to vector<2x8x32xf32>
    %37 = vector.extract_strided_slice %32 {offsets = [0, 64], sizes = [16, 32], strides = [1, 1]} : vector<16x96xf32> to vector<16x32xf32>
    %38 = vector.shape_cast %37 : vector<16x32xf32> to vector<2x8x32xf32>
    %39 = vector.extract_strided_slice %34 {offsets = [0, 0, 0], sizes = [2, 8, 8], strides = [1, 1, 1]} : vector<2x8x32xf32> to vector<2x8x8xf32>
    %40 = vector.extract_strided_slice %36 {offsets = [0, 0, 0], sizes = [2, 8, 8], strides = [1, 1, 1]} : vector<2x8x32xf32> to vector<2x8x8xf32>
    %41 = vector.extract_strided_slice %38 {offsets = [0, 0, 0], sizes = [2, 8, 8], strides = [1, 1, 1]} : vector<2x8x32xf32> to vector<2x8x8xf32>
    "tpu.trace_start"() <{level = 10 : i32, message = "bqd,bkd->bqk"}> : () -> ()
    %cst_17 = arith.constant dense<0.000000e+00> : vector<2x8x8xf32>
    %42 = tpu.matmul %39, %40, %cst_17 {dimension_numbers = #tpu.dot_dimension_numbers<[2], [2], [1], [1], [0, 0, 0, 1, 1, 1], [0], [0]>} : vector<2x8x8xf32>, vector<2x8x8xf32>, vector<2x8x8xf32> -> vector<2x8x8xf32>
    "tpu.trace_stop"() : () -> ()
    %cst_18 = arith.constant 0.353553385 : f32
    %43 = vector.broadcast %cst_18 : f32 to vector<2x8x8xf32>
    %44 = arith.mulf %42, %43 : vector<2x8x8xf32>
    %cst_19 = arith.constant dense<0xFF800000> : vector<2x8xf32>
    %45 = vector.multi_reduction <maximumf>, %44, %cst_19 [2] : vector<2x8x8xf32> to vector<2x8xf32>
    %46 = vector.shape_cast %45 : vector<2x8xf32> to vector<2x8x1xf32>
    %47 = vector.broadcast %46 : vector<2x8x1xf32> to vector<2x8x8xf32>
    %48 = arith.subf %44, %47 : vector<2x8x8xf32>
    %49 = math.exp %48 : vector<2x8x8xf32>
    %cst_20 = arith.constant dense<0.000000e+00> : vector<2x8xf32>
    %50 = vector.multi_reduction <add>, %49, %cst_20 [2] : vector<2x8x8xf32> to vector<2x8xf32>
    %51 = vector.shape_cast %50 : vector<2x8xf32> to vector<2x8x1xf32>
    %52 = tpu.reciprocal %51 {approx = true} : vector<2x8x1xf32> -> vector<2x8x1xf32>
    %53 = vector.broadcast %52 : vector<2x8x1xf32> to vector<2x8x8xf32>
    %54 = arith.mulf %49, %53 : vector<2x8x8xf32>
    "tpu.trace_start"() <{level = 10 : i32, message = "bqk,bkd->bqd"}> : () -> ()
    %cst_21 = arith.constant dense<0.000000e+00> : vector<2x8x8xf32>
    %55 = tpu.matmul %54, %41, %cst_21 {dimension_numbers = #tpu.dot_dimension_numbers<[2], [1], [1], [2], [0, 0, 0, 1, 1, 2], [0], [0]>} : vector<2x8x8xf32>, vector<2x8x8xf32>, vector<2x8x8xf32> -> vector<2x8x8xf32>
    "tpu.trace_stop"() : () -> ()
    %56 = vector.extract_strided_slice %34 {offsets = [0, 0, 8], sizes = [2, 8, 8], strides = [1, 1, 1]} : vector<2x8x32xf32> to vector<2x8x8xf32>
    %57 = vector.extract_strided_slice %36 {offsets = [0, 0, 8], sizes = [2, 8, 8], strides = [1, 1, 1]} : vector<2x8x32xf32> to vector<2x8x8xf32>
    %58 = vector.extract_strided_slice %38 {offsets = [0, 0, 8], sizes = [2, 8, 8], strides = [1, 1, 1]} : vector<2x8x32xf32> to vector<2x8x8xf32>
    "tpu.trace_start"() <{level = 10 : i32, message = "bqd,bkd->bqk"}> : () -> ()
    %cst_22 = arith.constant dense<0.000000e+00> : vector<2x8x8xf32>
    %59 = tpu.matmul %56, %57, %cst_22 {dimension_numbers = #tpu.dot_dimension_numbers<[2], [2], [1], [1], [0, 0, 0, 1, 1, 1], [0], [0]>} : vector<2x8x8xf32>, vector<2x8x8xf32>, vector<2x8x8xf32> -> vector<2x8x8xf32>
    "tpu.trace_stop"() : () -> ()
    %cst_23 = arith.constant 0.353553385 : f32
    %60 = vector.broadcast %cst_23 : f32 to vector<2x8x8xf32>
    %61 = arith.mulf %59, %60 : vector<2x8x8xf32>
    %cst_24 = arith.constant dense<0xFF800000> : vector<2x8xf32>
    %62 = vector.multi_reduction <maximumf>, %61, %cst_24 [2] : vector<2x8x8xf32> to vector<2x8xf32>
    %63 = vector.shape_cast %62 : vector<2x8xf32> to vector<2x8x1xf32>
    %64 = vector.broadcast %63 : vector<2x8x1xf32> to vector<2x8x8xf32>
    %65 = arith.subf %61, %64 : vector<2x8x8xf32>
    %66 = math.exp %65 : vector<2x8x8xf32>
    %cst_25 = arith.constant dense<0.000000e+00> : vector<2x8xf32>
    %67 = vector.multi_reduction <add>, %66, %cst_25 [2] : vector<2x8x8xf32> to vector<2x8xf32>
    %68 = vector.shape_cast %67 : vector<2x8xf32> to vector<2x8x1xf32>
    %69 = tpu.reciprocal %68 {approx = true} : vector<2x8x1xf32> -> vector<2x8x1xf32>
    %70 = vector.broadcast %69 : vector<2x8x1xf32> to vector<2x8x8xf32>
    %71 = arith.mulf %66, %70 : vector<2x8x8xf32>
    "tpu.trace_start"() <{level = 10 : i32, message = "bqk,bkd->bqd"}> : () -> ()
    %cst_26 = arith.constant dense<0.000000e+00> : vector<2x8x8xf32>
    %72 = tpu.matmul %71, %58, %cst_26 {dimension_numbers = #tpu.dot_dimension_numbers<[2], [1], [1], [2], [0, 0, 0, 1, 1, 2], [0], [0]>} : vector<2x8x8xf32>, vector<2x8x8xf32>, vector<2x8x8xf32> -> vector<2x8x8xf32>
    "tpu.trace_stop"() : () -> ()
    %73 = vector.extract_strided_slice %34 {offsets = [0, 0, 16], sizes = [2, 8, 8], strides = [1, 1, 1]} : vector<2x8x32xf32> to vector<2x8x8xf32>
    %74 = vector.extract_strided_slice %36 {offsets = [0, 0, 16], sizes = [2, 8, 8], strides = [1, 1, 1]} : vector<2x8x32xf32> to vector<2x8x8xf32>
    %75 = vector.extract_strided_slice %38 {offsets = [0, 0, 16], sizes = [2, 8, 8], strides = [1, 1, 1]} : vector<2x8x32xf32> to vector<2x8x8xf32>
    "tpu.trace_start"() <{level = 10 : i32, message = "bqd,bkd->bqk"}> : () -> ()
    %cst_27 = arith.constant dense<0.000000e+00> : vector<2x8x8xf32>
    %76 = tpu.matmul %73, %74, %cst_27 {dimension_numbers = #tpu.dot_dimension_numbers<[2], [2], [1], [1], [0, 0, 0, 1, 1, 1], [0], [0]>} : vector<2x8x8xf32>, vector<2x8x8xf32>, vector<2x8x8xf32> -> vector<2x8x8xf32>
    "tpu.trace_stop"() : () -> ()
    %cst_28 = arith.constant 0.353553385 : f32
    %77 = vector.broadcast %cst_28 : f32 to vector<2x8x8xf32>
    %78 = arith.mulf %76, %77 : vector<2x8x8xf32>
    %cst_29 = arith.constant dense<0xFF800000> : vector<2x8xf32>
    %79 = vector.multi_reduction <maximumf>, %78, %cst_29 [2] : vector<2x8x8xf32> to vector<2x8xf32>
    %80 = vector.shape_cast %79 : vector<2x8xf32> to vector<2x8x1xf32>
    %81 = vector.broadcast %80 : vector<2x8x1xf32> to vector<2x8x8xf32>
    %82 = arith.subf %78, %81 : vector<2x8x8xf32>
    %83 = math.exp %82 : vector<2x8x8xf32>
    %cst_30 = arith.constant dense<0.000000e+00> : vector<2x8xf32>
    %84 = vector.multi_reduction <add>, %83, %cst_30 [2] : vector<2x8x8xf32> to vector<2x8xf32>
    %85 = vector.shape_cast %84 : vector<2x8xf32> to vector<2x8x1xf32>
    %86 = tpu.reciprocal %85 {approx = true} : vector<2x8x1xf32> -> vector<2x8x1xf32>
    %87 = vector.broadcast %86 : vector<2x8x1xf32> to vector<2x8x8xf32>
    %88 = arith.mulf %83, %87 : vector<2x8x8xf32>
    "tpu.trace_start"() <{level = 10 : i32, message = "bqk,bkd->bqd"}> : () -> ()
    %cst_31 = arith.constant dense<0.000000e+00> : vector<2x8x8xf32>
    %89 = tpu.matmul %88, %75, %cst_31 {dimension_numbers = #tpu.dot_dimension_numbers<[2], [1], [1], [2], [0, 0, 0, 1, 1, 2], [0], [0]>} : vector<2x8x8xf32>, vector<2x8x8xf32>, vector<2x8x8xf32> -> vector<2x8x8xf32>
    "tpu.trace_stop"() : () -> ()
    %90 = vector.extract_strided_slice %34 {offsets = [0, 0, 24], sizes = [2, 8, 8], strides = [1, 1, 1]} : vector<2x8x32xf32> to vector<2x8x8xf32>
    %91 = vector.extract_strided_slice %36 {offsets = [0, 0, 24], sizes = [2, 8, 8], strides = [1, 1, 1]} : vector<2x8x32xf32> to vector<2x8x8xf32>
    %92 = vector.extract_strided_slice %38 {offsets = [0, 0, 24], sizes = [2, 8, 8], strides = [1, 1, 1]} : vector<2x8x32xf32> to vector<2x8x8xf32>
    "tpu.trace_start"() <{level = 10 : i32, message = "bqd,bkd->bqk"}> : () -> ()
    %cst_32 = arith.constant dense<0.000000e+00> : vector<2x8x8xf32>
    %93 = tpu.matmul %90, %91, %cst_32 {dimension_numbers = #tpu.dot_dimension_numbers<[2], [2], [1], [1], [0, 0, 0, 1, 1, 1], [0], [0]>} : vector<2x8x8xf32>, vector<2x8x8xf32>, vector<2x8x8xf32> -> vector<2x8x8xf32>
    "tpu.trace_stop"() : () -> ()
    %cst_33 = arith.constant 0.353553385 : f32
    %94 = vector.broadcast %cst_33 : f32 to vector<2x8x8xf32>
    %95 = arith.mulf %93, %94 : vector<2x8x8xf32>
    %cst_34 = arith.constant dense<0xFF800000> : vector<2x8xf32>
    %96 = vector.multi_reduction <maximumf>, %95, %cst_34 [2] : vector<2x8x8xf32> to vector<2x8xf32>
    %97 = vector.shape_cast %96 : vector<2x8xf32> to vector<2x8x1xf32>
    %98 = vector.broadcast %97 : vector<2x8x1xf32> to vector<2x8x8xf32>
    %99 = arith.subf %95, %98 : vector<2x8x8xf32>
    %100 = math.exp %99 : vector<2x8x8xf32>
    %cst_35 = arith.constant dense<0.000000e+00> : vector<2x8xf32>
    %101 = vector.multi_reduction <add>, %100, %cst_35 [2] : vector<2x8x8xf32> to vector<2x8xf32>
    %102 = vector.shape_cast %101 : vector<2x8xf32> to vector<2x8x1xf32>
    %103 = tpu.reciprocal %102 {approx = true} : vector<2x8x1xf32> -> vector<2x8x1xf32>
    %104 = vector.broadcast %103 : vector<2x8x1xf32> to vector<2x8x8xf32>
    %105 = arith.mulf %100, %104 : vector<2x8x8xf32>
    "tpu.trace_start"() <{level = 10 : i32, message = "bqk,bkd->bqd"}> : () -> ()
    %cst_36 = arith.constant dense<0.000000e+00> : vector<2x8x8xf32>
    %106 = tpu.matmul %105, %92, %cst_36 {dimension_numbers = #tpu.dot_dimension_numbers<[2], [1], [1], [2], [0, 0, 0, 1, 1, 2], [0], [0]>} : vector<2x8x8xf32>, vector<2x8x8xf32>, vector<2x8x8xf32> -> vector<2x8x8xf32>
    "tpu.trace_stop"() : () -> ()
    %107 = tpu.concatenate %55, %72, %89, %106 in 2 : vector<2x8x8xf32>, vector<2x8x8xf32>, vector<2x8x8xf32>, vector<2x8x8xf32> -> vector<2x8x32xf32>
    %108 = vector.shape_cast %107 : vector<2x8x32xf32> to vector<16x32xf32>
    %c0_37 = arith.constant 0 : index
    %c0_38 = arith.constant 0 : index
    %c0_39 = arith.constant 0 : index
    %109 = vector.load %arg5[%c0_37, %c0_38, %c0_39] : memref<2x32x32xf32, #tpu.memory_space<vmem>>, vector<1x32x32xf32>
    %110 = vector.shape_cast %109 : vector<1x32x32xf32> to vector<32x32xf32>
    %cst_40 = arith.constant dense<0.000000e+00> : vector<16x32xf32>
    %111 = tpu.matmul %108, %110, %cst_40 {dimension_numbers = #tpu.dot_dimension_numbers<[1], [0], [0], [1], [0, 0, 1, 1], [], []>} : vector<16x32xf32>, vector<32x32xf32>, vector<16x32xf32> -> vector<16x32xf32>
    %c0_41 = arith.constant 0 : index
    %c0_42 = arith.constant 0 : index
    %c0_43 = arith.constant 0 : index
    %112 = vector.load %arg6[%c0_41, %c0_42, %c0_43] : memref<2x1x32xf32, #tpu.memory_space<vmem>>, vector<1x1x32xf32>
    %113 = vector.shape_cast %112 : vector<1x1x32xf32> to vector<1x32xf32>
    %114 = vector.broadcast %113 : vector<1x32xf32> to vector<16x32xf32>
    %115 = arith.addf %111, %114 : vector<16x32xf32>
    %116 = arith.addf %25, %115 : vector<16x32xf32>
    %c0_44 = arith.constant 0 : index
    %c0_45 = arith.constant 0 : index
    %c0_46 = arith.constant 0 : index
    %117 = vector.load %arg7[%c0_44, %c0_45, %c0_46] : memref<2x1x32xf32, #tpu.memory_space<vmem>>, vector<1x1x32xf32>
    %118 = vector.shape_cast %117 : vector<1x1x32xf32> to vector<1x32xf32>
    %c0_47 = arith.constant 0 : index
    %c0_48 = arith.constant 0 : index
    %c0_49 = arith.constant 0 : index
    %119 = vector.load %arg8[%c0_47, %c0_48, %c0_49] : memref<2x1x32xf32, #tpu.memory_space<vmem>>, vector<1x1x32xf32>
    %120 = vector.shape_cast %119 : vector<1x1x32xf32> to vector<1x32xf32>
    %cst_50 = arith.constant dense<0.000000e+00> : vector<16xf32>
    %121 = vector.multi_reduction <add>, %116, %cst_50 [1] : vector<16x32xf32> to vector<16xf32>
    %122 = vector.shape_cast %121 : vector<16xf32> to vector<16x1xf32>
    %cst_51 = arith.constant 3.200000e+01 : f32
    %123 = vector.broadcast %cst_51 : f32 to vector<16x1xf32>
    %124 = arith.divf %122, %123 : vector<16x1xf32>
    %125 = vector.broadcast %124 : vector<16x1xf32> to vector<16x32xf32>
    %126 = arith.subf %116, %125 : vector<16x32xf32>
    %127 = arith.mulf %126, %126 : vector<16x32xf32>
    %cst_52 = arith.constant dense<0.000000e+00> : vector<16xf32>
    %128 = vector.multi_reduction <add>, %127, %cst_52 [1] : vector<16x32xf32> to vector<16xf32>
    %129 = vector.shape_cast %128 : vector<16xf32> to vector<16x1xf32>
    %cst_53 = arith.constant 3.200000e+01 : f32
    %130 = vector.broadcast %cst_53 : f32 to vector<16x1xf32>
    %131 = arith.divf %129, %130 : vector<16x1xf32>
    %132 = vector.broadcast %124 : vector<16x1xf32> to vector<16x32xf32>
    %133 = arith.subf %116, %132 : vector<16x32xf32>
    %cst_54 = arith.constant 9.99999996E-13 : f32
    %134 = vector.broadcast %cst_54 : f32 to vector<16x1xf32>
    %135 = arith.addf %131, %134 : vector<16x1xf32>
    %136 = math.rsqrt %135 : vector<16x1xf32>
    %137 = vector.broadcast %136 : vector<16x1xf32> to vector<16x32xf32>
    %138 = arith.mulf %133, %137 : vector<16x32xf32>
    %139 = vector.broadcast %118 : vector<1x32xf32> to vector<16x32xf32>
    %140 = arith.mulf %138, %139 : vector<16x32xf32>
    %141 = vector.broadcast %120 : vector<1x32xf32> to vector<16x32xf32>
    %142 = arith.addf %140, %141 : vector<16x32xf32>
    %c0_55 = arith.constant 0 : index
    %c0_56 = arith.constant 0 : index
    %c0_57 = arith.constant 0 : index
    %143 = vector.load %arg9[%c0_55, %c0_56, %c0_57] : memref<2x32x64xf32, #tpu.memory_space<vmem>>, vector<1x32x64xf32>
    %144 = vector.shape_cast %143 : vector<1x32x64xf32> to vector<32x64xf32>
    %cst_58 = arith.constant dense<0.000000e+00> : vector<16x64xf32>
    %145 = tpu.matmul %142, %144, %cst_58 {dimension_numbers = #tpu.dot_dimension_numbers<[1], [0], [0], [1], [0, 0, 1, 1], [], []>} : vector<16x32xf32>, vector<32x64xf32>, vector<16x64xf32> -> vector<16x64xf32>
    %c0_59 = arith.constant 0 : index
    %c0_60 = arith.constant 0 : index
    %c0_61 = arith.constant 0 : index
    %146 = vector.load %arg10[%c0_59, %c0_60, %c0_61] : memref<2x1x64xf32, #tpu.memory_space<vmem>>, vector<1x1x64xf32>
    %147 = vector.shape_cast %146 : vector<1x1x64xf32> to vector<1x64xf32>
    %148 = vector.broadcast %147 : vector<1x64xf32> to vector<16x64xf32>
    %149 = arith.addf %145, %148 : vector<16x64xf32>
    %cst_62 = arith.constant 5.000000e-01 : f32
    %150 = vector.broadcast %cst_62 : f32 to vector<16x64xf32>
    %151 = arith.mulf %150, %149 : vector<16x64xf32>
    %cst_63 = arith.constant 4.471500e-02 : f32
    %152 = vector.broadcast %cst_63 : f32 to vector<16x64xf32>
    %153 = arith.mulf %152, %149 : vector<16x64xf32>
    %154 = arith.mulf %153, %149 : vector<16x64xf32>
    %155 = arith.mulf %154, %149 : vector<16x64xf32>
    %156 = arith.addf %149, %155 : vector<16x64xf32>
    %cst_64 = arith.constant 0.797884583 : f32
    %157 = vector.broadcast %cst_64 : f32 to vector<16x64xf32>
    %158 = arith.mulf %157, %156 : vector<16x64xf32>
    %159 = math.tanh %158 : vector<16x64xf32>
    %cst_65 = arith.constant 1.000000e+00 : f32
    %160 = vector.broadcast %cst_65 : f32 to vector<16x64xf32>
    %161 = arith.addf %160, %159 : vector<16x64xf32>
    %162 = arith.mulf %151, %161 : vector<16x64xf32>
    %c0_66 = arith.constant 0 : index
    %c0_67 = arith.constant 0 : index
    %c0_68 = arith.constant 0 : index
    %163 = vector.load %arg11[%c0_66, %c0_67, %c0_68] : memref<2x64x32xf32, #tpu.memory_space<vmem>>, vector<1x64x32xf32>
    %164 = vector.shape_cast %163 : vector<1x64x32xf32> to vector<64x32xf32>
    %cst_69 = arith.constant dense<0.000000e+00> : vector<16x32xf32>
    %165 = tpu.matmul %162, %164, %cst_69 {dimension_numbers = #tpu.dot_dimension_numbers<[1], [0], [0], [1], [0, 0, 1, 1], [], []>} : vector<16x64xf32>, vector<64x32xf32>, vector<16x32xf32> -> vector<16x32xf32>
    %c0_70 = arith.constant 0 : index
    %c0_71 = arith.constant 0 : index
    %c0_72 = arith.constant 0 : index
    %166 = vector.load %arg12[%c0_70, %c0_71, %c0_72] : memref<2x1x32xf32, #tpu.memory_space<vmem>>, vector<1x1x32xf32>
    %167 = vector.shape_cast %166 : vector<1x1x32xf32> to vector<1x32xf32>
    %168 = vector.broadcast %167 : vector<1x32xf32> to vector<16x32xf32>
    %169 = arith.addf %165, %168 : vector<16x32xf32>
    %170 = arith.addf %142, %169 : vector<16x32xf32>
    %c0_73 = arith.constant 0 : index
    %c0_74 = arith.constant 0 : index
    %c0_75 = arith.constant 0 : index
    %171 = vector.load %arg13[%c0_73, %c0_74, %c0_75] : memref<2x1x32xf32, #tpu.memory_space<vmem>>, vector<1x1x32xf32>
    %172 = vector.shape_cast %171 : vector<1x1x32xf32> to vector<1x32xf32>
    %c0_76 = arith.constant 0 : index
    %c0_77 = arith.constant 0 : index
    %c0_78 = arith.constant 0 : index
    %173 = vector.load %arg14[%c0_76, %c0_77, %c0_78] : memref<2x1x32xf32, #tpu.memory_space<vmem>>, vector<1x1x32xf32>
    %174 = vector.shape_cast %173 : vector<1x1x32xf32> to vector<1x32xf32>
    %cst_79 = arith.constant dense<0.000000e+00> : vector<16xf32>
    %175 = vector.multi_reduction <add>, %170, %cst_79 [1] : vector<16x32xf32> to vector<16xf32>
    %176 = vector.shape_cast %175 : vector<16xf32> to vector<16x1xf32>
    %cst_80 = arith.constant 3.200000e+01 : f32
    %177 = vector.broadcast %cst_80 : f32 to vector<16x1xf32>
    %178 = arith.divf %176, %177 : vector<16x1xf32>
    %179 = vector.broadcast %178 : vector<16x1xf32> to vector<16x32xf32>
    %180 = arith.subf %170, %179 : vector<16x32xf32>
    %181 = arith.mulf %180, %180 : vector<16x32xf32>
    %cst_81 = arith.constant dense<0.000000e+00> : vector<16xf32>
    %182 = vector.multi_reduction <add>, %181, %cst_81 [1] : vector<16x32xf32> to vector<16xf32>
    %183 = vector.shape_cast %182 : vector<16xf32> to vector<16x1xf32>
    %cst_82 = arith.constant 3.200000e+01 : f32
    %184 = vector.broadcast %cst_82 : f32 to vector<16x1xf32>
    %185 = arith.divf %183, %184 : vector<16x1xf32>
    %186 = vector.broadcast %178 : vector<16x1xf32> to vector<16x32xf32>
    %187 = arith.subf %170, %186 : vector<16x32xf32>
    %cst_83 = arith.constant 9.99999996E-13 : f32
    %188 = vector.broadcast %cst_83 : f32 to vector<16x1xf32>
    %189 = arith.addf %185, %188 : vector<16x1xf32>
    %190 = math.rsqrt %189 : vector<16x1xf32>
    %191 = vector.broadcast %190 : vector<16x1xf32> to vector<16x32xf32>
    %192 = arith.mulf %187, %191 : vector<16x32xf32>
    %193 = vector.broadcast %172 : vector<1x32xf32> to vector<16x32xf32>
    %194 = arith.mulf %192, %193 : vector<16x32xf32>
    %195 = vector.broadcast %174 : vector<1x32xf32> to vector<16x32xf32>
    %196 = arith.addf %194, %195 : vector<16x32xf32>
    %c1 = arith.constant 1 : index
    %c0_84 = arith.constant 0 : index
    %c0_85 = arith.constant 0 : index
    %197 = vector.load %arg3[%c1, %c0_84, %c0_85] : memref<2x32x96xf32, #tpu.memory_space<vmem>>, vector<1x32x96xf32>
    %198 = vector.shape_cast %197 : vector<1x32x96xf32> to vector<32x96xf32>
    %cst_86 = arith.constant dense<0.000000e+00> : vector<16x96xf32>
    %199 = tpu.matmul %196, %198, %cst_86 {dimension_numbers = #tpu.dot_dimension_numbers<[1], [0], [0], [1], [0, 0, 1, 1], [], []>} : vector<16x32xf32>, vector<32x96xf32>, vector<16x96xf32> -> vector<16x96xf32>
    %c1_87 = arith.constant 1 : index
    %c0_88 = arith.constant 0 : index
    %c0_89 = arith.constant 0 : index
    %200 = vector.load %arg4[%c1_87, %c0_88, %c0_89] : memref<2x1x96xf32, #tpu.memory_space<vmem>>, vector<1x1x96xf32>
    %201 = vector.shape_cast %200 : vector<1x1x96xf32> to vector<1x96xf32>
    %202 = vector.broadcast %201 : vector<1x96xf32> to vector<16x96xf32>
    %203 = arith.addf %199, %202 : vector<16x96xf32>
    %204 = vector.extract_strided_slice %203 {offsets = [0, 0], sizes = [16, 32], strides = [1, 1]} : vector<16x96xf32> to vector<16x32xf32>
    %205 = vector.shape_cast %204 : vector<16x32xf32> to vector<2x8x32xf32>
    %206 = vector.extract_strided_slice %203 {offsets = [0, 32], sizes = [16, 32], strides = [1, 1]} : vector<16x96xf32> to vector<16x32xf32>
    %207 = vector.shape_cast %206 : vector<16x32xf32> to vector<2x8x32xf32>
    %208 = vector.extract_strided_slice %203 {offsets = [0, 64], sizes = [16, 32], strides = [1, 1]} : vector<16x96xf32> to vector<16x32xf32>
    %209 = vector.shape_cast %208 : vector<16x32xf32> to vector<2x8x32xf32>
    %210 = vector.extract_strided_slice %205 {offsets = [0, 0, 0], sizes = [2, 8, 8], strides = [1, 1, 1]} : vector<2x8x32xf32> to vector<2x8x8xf32>
    %211 = vector.extract_strided_slice %207 {offsets = [0, 0, 0], sizes = [2, 8, 8], strides = [1, 1, 1]} : vector<2x8x32xf32> to vector<2x8x8xf32>
    %212 = vector.extract_strided_slice %209 {offsets = [0, 0, 0], sizes = [2, 8, 8], strides = [1, 1, 1]} : vector<2x8x32xf32> to vector<2x8x8xf32>
    "tpu.trace_start"() <{level = 10 : i32, message = "bqd,bkd->bqk"}> : () -> ()
    %cst_90 = arith.constant dense<0.000000e+00> : vector<2x8x8xf32>
    %213 = tpu.matmul %210, %211, %cst_90 {dimension_numbers = #tpu.dot_dimension_numbers<[2], [2], [1], [1], [0, 0, 0, 1, 1, 1], [0], [0]>} : vector<2x8x8xf32>, vector<2x8x8xf32>, vector<2x8x8xf32> -> vector<2x8x8xf32>
    "tpu.trace_stop"() : () -> ()
    %cst_91 = arith.constant 0.353553385 : f32
    %214 = vector.broadcast %cst_91 : f32 to vector<2x8x8xf32>
    %215 = arith.mulf %213, %214 : vector<2x8x8xf32>
    %cst_92 = arith.constant dense<0xFF800000> : vector<2x8xf32>
    %216 = vector.multi_reduction <maximumf>, %215, %cst_92 [2] : vector<2x8x8xf32> to vector<2x8xf32>
    %217 = vector.shape_cast %216 : vector<2x8xf32> to vector<2x8x1xf32>
    %218 = vector.broadcast %217 : vector<2x8x1xf32> to vector<2x8x8xf32>
    %219 = arith.subf %215, %218 : vector<2x8x8xf32>
    %220 = math.exp %219 : vector<2x8x8xf32>
    %cst_93 = arith.constant dense<0.000000e+00> : vector<2x8xf32>
    %221 = vector.multi_reduction <add>, %220, %cst_93 [2] : vector<2x8x8xf32> to vector<2x8xf32>
    %222 = vector.shape_cast %221 : vector<2x8xf32> to vector<2x8x1xf32>
    %223 = tpu.reciprocal %222 {approx = true} : vector<2x8x1xf32> -> vector<2x8x1xf32>
    %224 = vector.broadcast %223 : vector<2x8x1xf32> to vector<2x8x8xf32>
    %225 = arith.mulf %220, %224 : vector<2x8x8xf32>
    "tpu.trace_start"() <{level = 10 : i32, message = "bqk,bkd->bqd"}> : () -> ()
    %cst_94 = arith.constant dense<0.000000e+00> : vector<2x8x8xf32>
    %226 = tpu.matmul %225, %212, %cst_94 {dimension_numbers = #tpu.dot_dimension_numbers<[2], [1], [1], [2], [0, 0, 0, 1, 1, 2], [0], [0]>} : vector<2x8x8xf32>, vector<2x8x8xf32>, vector<2x8x8xf32> -> vector<2x8x8xf32>
    "tpu.trace_stop"() : () -> ()
    %227 = vector.extract_strided_slice %205 {offsets = [0, 0, 8], sizes = [2, 8, 8], strides = [1, 1, 1]} : vector<2x8x32xf32> to vector<2x8x8xf32>
    %228 = vector.extract_strided_slice %207 {offsets = [0, 0, 8], sizes = [2, 8, 8], strides = [1, 1, 1]} : vector<2x8x32xf32> to vector<2x8x8xf32>
    %229 = vector.extract_strided_slice %209 {offsets = [0, 0, 8], sizes = [2, 8, 8], strides = [1, 1, 1]} : vector<2x8x32xf32> to vector<2x8x8xf32>
    "tpu.trace_start"() <{level = 10 : i32, message = "bqd,bkd->bqk"}> : () -> ()
    %cst_95 = arith.constant dense<0.000000e+00> : vector<2x8x8xf32>
    %230 = tpu.matmul %227, %228, %cst_95 {dimension_numbers = #tpu.dot_dimension_numbers<[2], [2], [1], [1], [0, 0, 0, 1, 1, 1], [0], [0]>} : vector<2x8x8xf32>, vector<2x8x8xf32>, vector<2x8x8xf32> -> vector<2x8x8xf32>
    "tpu.trace_stop"() : () -> ()
    %cst_96 = arith.constant 0.353553385 : f32
    %231 = vector.broadcast %cst_96 : f32 to vector<2x8x8xf32>
    %232 = arith.mulf %230, %231 : vector<2x8x8xf32>
    %cst_97 = arith.constant dense<0xFF800000> : vector<2x8xf32>
    %233 = vector.multi_reduction <maximumf>, %232, %cst_97 [2] : vector<2x8x8xf32> to vector<2x8xf32>
    %234 = vector.shape_cast %233 : vector<2x8xf32> to vector<2x8x1xf32>
    %235 = vector.broadcast %234 : vector<2x8x1xf32> to vector<2x8x8xf32>
    %236 = arith.subf %232, %235 : vector<2x8x8xf32>
    %237 = math.exp %236 : vector<2x8x8xf32>
    %cst_98 = arith.constant dense<0.000000e+00> : vector<2x8xf32>
    %238 = vector.multi_reduction <add>, %237, %cst_98 [2] : vector<2x8x8xf32> to vector<2x8xf32>
    %239 = vector.shape_cast %238 : vector<2x8xf32> to vector<2x8x1xf32>
    %240 = tpu.reciprocal %239 {approx = true} : vector<2x8x1xf32> -> vector<2x8x1xf32>
    %241 = vector.broadcast %240 : vector<2x8x1xf32> to vector<2x8x8xf32>
    %242 = arith.mulf %237, %241 : vector<2x8x8xf32>
    "tpu.trace_start"() <{level = 10 : i32, message = "bqk,bkd->bqd"}> : () -> ()
    %cst_99 = arith.constant dense<0.000000e+00> : vector<2x8x8xf32>
    %243 = tpu.matmul %242, %229, %cst_99 {dimension_numbers = #tpu.dot_dimension_numbers<[2], [1], [1], [2], [0, 0, 0, 1, 1, 2], [0], [0]>} : vector<2x8x8xf32>, vector<2x8x8xf32>, vector<2x8x8xf32> -> vector<2x8x8xf32>
    "tpu.trace_stop"() : () -> ()
    %244 = vector.extract_strided_slice %205 {offsets = [0, 0, 16], sizes = [2, 8, 8], strides = [1, 1, 1]} : vector<2x8x32xf32> to vector<2x8x8xf32>
    %245 = vector.extract_strided_slice %207 {offsets = [0, 0, 16], sizes = [2, 8, 8], strides = [1, 1, 1]} : vector<2x8x32xf32> to vector<2x8x8xf32>
    %246 = vector.extract_strided_slice %209 {offsets = [0, 0, 16], sizes = [2, 8, 8], strides = [1, 1, 1]} : vector<2x8x32xf32> to vector<2x8x8xf32>
    "tpu.trace_start"() <{level = 10 : i32, message = "bqd,bkd->bqk"}> : () -> ()
    %cst_100 = arith.constant dense<0.000000e+00> : vector<2x8x8xf32>
    %247 = tpu.matmul %244, %245, %cst_100 {dimension_numbers = #tpu.dot_dimension_numbers<[2], [2], [1], [1], [0, 0, 0, 1, 1, 1], [0], [0]>} : vector<2x8x8xf32>, vector<2x8x8xf32>, vector<2x8x8xf32> -> vector<2x8x8xf32>
    "tpu.trace_stop"() : () -> ()
    %cst_101 = arith.constant 0.353553385 : f32
    %248 = vector.broadcast %cst_101 : f32 to vector<2x8x8xf32>
    %249 = arith.mulf %247, %248 : vector<2x8x8xf32>
    %cst_102 = arith.constant dense<0xFF800000> : vector<2x8xf32>
    %250 = vector.multi_reduction <maximumf>, %249, %cst_102 [2] : vector<2x8x8xf32> to vector<2x8xf32>
    %251 = vector.shape_cast %250 : vector<2x8xf32> to vector<2x8x1xf32>
    %252 = vector.broadcast %251 : vector<2x8x1xf32> to vector<2x8x8xf32>
    %253 = arith.subf %249, %252 : vector<2x8x8xf32>
    %254 = math.exp %253 : vector<2x8x8xf32>
    %cst_103 = arith.constant dense<0.000000e+00> : vector<2x8xf32>
    %255 = vector.multi_reduction <add>, %254, %cst_103 [2] : vector<2x8x8xf32> to vector<2x8xf32>
    %256 = vector.shape_cast %255 : vector<2x8xf32> to vector<2x8x1xf32>
    %257 = tpu.reciprocal %256 {approx = true} : vector<2x8x1xf32> -> vector<2x8x1xf32>
    %258 = vector.broadcast %257 : vector<2x8x1xf32> to vector<2x8x8xf32>
    %259 = arith.mulf %254, %258 : vector<2x8x8xf32>
    "tpu.trace_start"() <{level = 10 : i32, message = "bqk,bkd->bqd"}> : () -> ()
    %cst_104 = arith.constant dense<0.000000e+00> : vector<2x8x8xf32>
    %260 = tpu.matmul %259, %246, %cst_104 {dimension_numbers = #tpu.dot_dimension_numbers<[2], [1], [1], [2], [0, 0, 0, 1, 1, 2], [0], [0]>} : vector<2x8x8xf32>, vector<2x8x8xf32>, vector<2x8x8xf32> -> vector<2x8x8xf32>
    "tpu.trace_stop"() : () -> ()
    %261 = vector.extract_strided_slice %205 {offsets = [0, 0, 24], sizes = [2, 8, 8], strides = [1, 1, 1]} : vector<2x8x32xf32> to vector<2x8x8xf32>
    %262 = vector.extract_strided_slice %207 {offsets = [0, 0, 24], sizes = [2, 8, 8], strides = [1, 1, 1]} : vector<2x8x32xf32> to vector<2x8x8xf32>
    %263 = vector.extract_strided_slice %209 {offsets = [0, 0, 24], sizes = [2, 8, 8], strides = [1, 1, 1]} : vector<2x8x32xf32> to vector<2x8x8xf32>
    "tpu.trace_start"() <{level = 10 : i32, message = "bqd,bkd->bqk"}> : () -> ()
    %cst_105 = arith.constant dense<0.000000e+00> : vector<2x8x8xf32>
    %264 = tpu.matmul %261, %262, %cst_105 {dimension_numbers = #tpu.dot_dimension_numbers<[2], [2], [1], [1], [0, 0, 0, 1, 1, 1], [0], [0]>} : vector<2x8x8xf32>, vector<2x8x8xf32>, vector<2x8x8xf32> -> vector<2x8x8xf32>
    "tpu.trace_stop"() : () -> ()
    %cst_106 = arith.constant 0.353553385 : f32
    %265 = vector.broadcast %cst_106 : f32 to vector<2x8x8xf32>
    %266 = arith.mulf %264, %265 : vector<2x8x8xf32>
    %cst_107 = arith.constant dense<0xFF800000> : vector<2x8xf32>
    %267 = vector.multi_reduction <maximumf>, %266, %cst_107 [2] : vector<2x8x8xf32> to vector<2x8xf32>
    %268 = vector.shape_cast %267 : vector<2x8xf32> to vector<2x8x1xf32>
    %269 = vector.broadcast %268 : vector<2x8x1xf32> to vector<2x8x8xf32>
    %270 = arith.subf %266, %269 : vector<2x8x8xf32>
    %271 = math.exp %270 : vector<2x8x8xf32>
    %cst_108 = arith.constant dense<0.000000e+00> : vector<2x8xf32>
    %272 = vector.multi_reduction <add>, %271, %cst_108 [2] : vector<2x8x8xf32> to vector<2x8xf32>
    %273 = vector.shape_cast %272 : vector<2x8xf32> to vector<2x8x1xf32>
    %274 = tpu.reciprocal %273 {approx = true} : vector<2x8x1xf32> -> vector<2x8x1xf32>
    %275 = vector.broadcast %274 : vector<2x8x1xf32> to vector<2x8x8xf32>
    %276 = arith.mulf %271, %275 : vector<2x8x8xf32>
    "tpu.trace_start"() <{level = 10 : i32, message = "bqk,bkd->bqd"}> : () -> ()
    %cst_109 = arith.constant dense<0.000000e+00> : vector<2x8x8xf32>
    %277 = tpu.matmul %276, %263, %cst_109 {dimension_numbers = #tpu.dot_dimension_numbers<[2], [1], [1], [2], [0, 0, 0, 1, 1, 2], [0], [0]>} : vector<2x8x8xf32>, vector<2x8x8xf32>, vector<2x8x8xf32> -> vector<2x8x8xf32>
    "tpu.trace_stop"() : () -> ()
    %278 = tpu.concatenate %226, %243, %260, %277 in 2 : vector<2x8x8xf32>, vector<2x8x8xf32>, vector<2x8x8xf32>, vector<2x8x8xf32> -> vector<2x8x32xf32>
    %279 = vector.shape_cast %278 : vector<2x8x32xf32> to vector<16x32xf32>
    %c1_110 = arith.constant 1 : index
    %c0_111 = arith.constant 0 : index
    %c0_112 = arith.constant 0 : index
    %280 = vector.load %arg5[%c1_110, %c0_111, %c0_112] : memref<2x32x32xf32, #tpu.memory_space<vmem>>, vector<1x32x32xf32>
    %281 = vector.shape_cast %280 : vector<1x32x32xf32> to vector<32x32xf32>
    %cst_113 = arith.constant dense<0.000000e+00> : vector<16x32xf32>
    %282 = tpu.matmul %279, %281, %cst_113 {dimension_numbers = #tpu.dot_dimension_numbers<[1], [0], [0], [1], [0, 0, 1, 1], [], []>} : vector<16x32xf32>, vector<32x32xf32>, vector<16x32xf32> -> vector<16x32xf32>
    %c1_114 = arith.constant 1 : index
    %c0_115 = arith.constant 0 : index
    %c0_116 = arith.constant 0 : index
    %283 = vector.load %arg6[%c1_114, %c0_115, %c0_116] : memref<2x1x32xf32, #tpu.memory_space<vmem>>, vector<1x1x32xf32>
    %284 = vector.shape_cast %283 : vector<1x1x32xf32> to vector<1x32xf32>
    %285 = vector.broadcast %284 : vector<1x32xf32> to vector<16x32xf32>
    %286 = arith.addf %282, %285 : vector<16x32xf32>
    %287 = arith.addf %196, %286 : vector<16x32xf32>
    %c1_117 = arith.constant 1 : index
    %c0_118 = arith.constant 0 : index
    %c0_119 = arith.constant 0 : index
    %288 = vector.load %arg7[%c1_117, %c0_118, %c0_119] : memref<2x1x32xf32, #tpu.memory_space<vmem>>, vector<1x1x32xf32>
    %289 = vector.shape_cast %288 : vector<1x1x32xf32> to vector<1x32xf32>
    %c1_120 = arith.constant 1 : index
    %c0_121 = arith.constant 0 : index
    %c0_122 = arith.constant 0 : index
    %290 = vector.load %arg8[%c1_120, %c0_121, %c0_122] : memref<2x1x32xf32, #tpu.memory_space<vmem>>, vector<1x1x32xf32>
    %291 = vector.shape_cast %290 : vector<1x1x32xf32> to vector<1x32xf32>
    %cst_123 = arith.constant dense<0.000000e+00> : vector<16xf32>
    %292 = vector.multi_reduction <add>, %287, %cst_123 [1] : vector<16x32xf32> to vector<16xf32>
    %293 = vector.shape_cast %292 : vector<16xf32> to vector<16x1xf32>
    %cst_124 = arith.constant 3.200000e+01 : f32
    %294 = vector.broadcast %cst_124 : f32 to vector<16x1xf32>
    %295 = arith.divf %293, %294 : vector<16x1xf32>
    %296 = vector.broadcast %295 : vector<16x1xf32> to vector<16x32xf32>
    %297 = arith.subf %287, %296 : vector<16x32xf32>
    %298 = arith.mulf %297, %297 : vector<16x32xf32>
    %cst_125 = arith.constant dense<0.000000e+00> : vector<16xf32>
    %299 = vector.multi_reduction <add>, %298, %cst_125 [1] : vector<16x32xf32> to vector<16xf32>
    %300 = vector.shape_cast %299 : vector<16xf32> to vector<16x1xf32>
    %cst_126 = arith.constant 3.200000e+01 : f32
    %301 = vector.broadcast %cst_126 : f32 to vector<16x1xf32>
    %302 = arith.divf %300, %301 : vector<16x1xf32>
    %303 = vector.broadcast %295 : vector<16x1xf32> to vector<16x32xf32>
    %304 = arith.subf %287, %303 : vector<16x32xf32>
    %cst_127 = arith.constant 9.99999996E-13 : f32
    %305 = vector.broadcast %cst_127 : f32 to vector<16x1xf32>
    %306 = arith.addf %302, %305 : vector<16x1xf32>
    %307 = math.rsqrt %306 : vector<16x1xf32>
    %308 = vector.broadcast %307 : vector<16x1xf32> to vector<16x32xf32>
    %309 = arith.mulf %304, %308 : vector<16x32xf32>
    %310 = vector.broadcast %289 : vector<1x32xf32> to vector<16x32xf32>
    %311 = arith.mulf %309, %310 : vector<16x32xf32>
    %312 = vector.broadcast %291 : vector<1x32xf32> to vector<16x32xf32>
    %313 = arith.addf %311, %312 : vector<16x32xf32>
    %c1_128 = arith.constant 1 : index
    %c0_129 = arith.constant 0 : index
    %c0_130 = arith.constant 0 : index
    %314 = vector.load %arg9[%c1_128, %c0_129, %c0_130] : memref<2x32x64xf32, #tpu.memory_space<vmem>>, vector<1x32x64xf32>
    %315 = vector.shape_cast %314 : vector<1x32x64xf32> to vector<32x64xf32>
    %cst_131 = arith.constant dense<0.000000e+00> : vector<16x64xf32>
    %316 = tpu.matmul %313, %315, %cst_131 {dimension_numbers = #tpu.dot_dimension_numbers<[1], [0], [0], [1], [0, 0, 1, 1], [], []>} : vector<16x32xf32>, vector<32x64xf32>, vector<16x64xf32> -> vector<16x64xf32>
    %c1_132 = arith.constant 1 : index
    %c0_133 = arith.constant 0 : index
    %c0_134 = arith.constant 0 : index
    %317 = vector.load %arg10[%c1_132, %c0_133, %c0_134] : memref<2x1x64xf32, #tpu.memory_space<vmem>>, vector<1x1x64xf32>
    %318 = vector.shape_cast %317 : vector<1x1x64xf32> to vector<1x64xf32>
    %319 = vector.broadcast %318 : vector<1x64xf32> to vector<16x64xf32>
    %320 = arith.addf %316, %319 : vector<16x64xf32>
    %cst_135 = arith.constant 5.000000e-01 : f32
    %321 = vector.broadcast %cst_135 : f32 to vector<16x64xf32>
    %322 = arith.mulf %321, %320 : vector<16x64xf32>
    %cst_136 = arith.constant 4.471500e-02 : f32
    %323 = vector.broadcast %cst_136 : f32 to vector<16x64xf32>
    %324 = arith.mulf %323, %320 : vector<16x64xf32>
    %325 = arith.mulf %324, %320 : vector<16x64xf32>
    %326 = arith.mulf %325, %320 : vector<16x64xf32>
    %327 = arith.addf %320, %326 : vector<16x64xf32>
    %cst_137 = arith.constant 0.797884583 : f32
    %328 = vector.broadcast %cst_137 : f32 to vector<16x64xf32>
    %329 = arith.mulf %328, %327 : vector<16x64xf32>
    %330 = math.tanh %329 : vector<16x64xf32>
    %cst_138 = arith.constant 1.000000e+00 : f32
    %331 = vector.broadcast %cst_138 : f32 to vector<16x64xf32>
    %332 = arith.addf %331, %330 : vector<16x64xf32>
    %333 = arith.mulf %322, %332 : vector<16x64xf32>
    %c1_139 = arith.constant 1 : index
    %c0_140 = arith.constant 0 : index
    %c0_141 = arith.constant 0 : index
    %334 = vector.load %arg11[%c1_139, %c0_140, %c0_141] : memref<2x64x32xf32, #tpu.memory_space<vmem>>, vector<1x64x32xf32>
    %335 = vector.shape_cast %334 : vector<1x64x32xf32> to vector<64x32xf32>
    %cst_142 = arith.constant dense<0.000000e+00> : vector<16x32xf32>
    %336 = tpu.matmul %333, %335, %cst_142 {dimension_numbers = #tpu.dot_dimension_numbers<[1], [0], [0], [1], [0, 0, 1, 1], [], []>} : vector<16x64xf32>, vector<64x32xf32>, vector<16x32xf32> -> vector<16x32xf32>
    %c1_143 = arith.constant 1 : index
    %c0_144 = arith.constant 0 : index
    %c0_145 = arith.constant 0 : index
    %337 = vector.load %arg12[%c1_143, %c0_144, %c0_145] : memref<2x1x32xf32, #tpu.memory_space<vmem>>, vector<1x1x32xf32>
    %338 = vector.shape_cast %337 : vector<1x1x32xf32> to vector<1x32xf32>
    %339 = vector.broadcast %338 : vector<1x32xf32> to vector<16x32xf32>
    %340 = arith.addf %336, %339 : vector<16x32xf32>
    %341 = arith.addf %313, %340 : vector<16x32xf32>
    %c1_146 = arith.constant 1 : index
    %c0_147 = arith.constant 0 : index
    %c0_148 = arith.constant 0 : index
    %342 = vector.load %arg13[%c1_146, %c0_147, %c0_148] : memref<2x1x32xf32, #tpu.memory_space<vmem>>, vector<1x1x32xf32>
    %343 = vector.shape_cast %342 : vector<1x1x32xf32> to vector<1x32xf32>
    %c1_149 = arith.constant 1 : index
    %c0_150 = arith.constant 0 : index
    %c0_151 = arith.constant 0 : index
    %344 = vector.load %arg14[%c1_149, %c0_150, %c0_151] : memref<2x1x32xf32, #tpu.memory_space<vmem>>, vector<1x1x32xf32>
    %345 = vector.shape_cast %344 : vector<1x1x32xf32> to vector<1x32xf32>
    %cst_152 = arith.constant dense<0.000000e+00> : vector<16xf32>
    %346 = vector.multi_reduction <add>, %341, %cst_152 [1] : vector<16x32xf32> to vector<16xf32>
    %347 = vector.shape_cast %346 : vector<16xf32> to vector<16x1xf32>
    %cst_153 = arith.constant 3.200000e+01 : f32
    %348 = vector.broadcast %cst_153 : f32 to vector<16x1xf32>
    %349 = arith.divf %347, %348 : vector<16x1xf32>
    %350 = vector.broadcast %349 : vector<16x1xf32> to vector<16x32xf32>
    %351 = arith.subf %341, %350 : vector<16x32xf32>
    %352 = arith.mulf %351, %351 : vector<16x32xf32>
    %cst_154 = arith.constant dense<0.000000e+00> : vector<16xf32>
    %353 = vector.multi_reduction <add>, %352, %cst_154 [1] : vector<16x32xf32> to vector<16xf32>
    %354 = vector.shape_cast %353 : vector<16xf32> to vector<16x1xf32>
    %cst_155 = arith.constant 3.200000e+01 : f32
    %355 = vector.broadcast %cst_155 : f32 to vector<16x1xf32>
    %356 = arith.divf %354, %355 : vector<16x1xf32>
    %357 = vector.broadcast %349 : vector<16x1xf32> to vector<16x32xf32>
    %358 = arith.subf %341, %357 : vector<16x32xf32>
    %cst_156 = arith.constant 9.99999996E-13 : f32
    %359 = vector.broadcast %cst_156 : f32 to vector<16x1xf32>
    %360 = arith.addf %356, %359 : vector<16x1xf32>
    %361 = math.rsqrt %360 : vector<16x1xf32>
    %362 = vector.broadcast %361 : vector<16x1xf32> to vector<16x32xf32>
    %363 = arith.mulf %358, %362 : vector<16x32xf32>
    %364 = vector.broadcast %343 : vector<1x32xf32> to vector<16x32xf32>
    %365 = arith.mulf %363, %364 : vector<16x32xf32>
    %366 = vector.broadcast %345 : vector<1x32xf32> to vector<16x32xf32>
    %367 = arith.addf %365, %366 : vector<16x32xf32>
    %368 = vector.shape_cast %367 : vector<16x32xf32> to vector<2x8x32xf32>
    %369 = vector.extract_strided_slice %368 {offsets = [0, 0, 0], sizes = [2, 1, 32], strides = [1, 1, 1]} : vector<2x8x32xf32> to vector<2x1x32xf32>
    %370 = vector.shape_cast %369 : vector<2x1x32xf32> to vector<2x32xf32>
    %371 = math.tanh %370 : vector<2x32xf32>
    %c0_157 = arith.constant 0 : index
    %c0_158 = arith.constant 0 : index
    %372 = vector.load %arg15[%c0_157, %c0_158] : memref<32x10xf32, #tpu.memory_space<vmem>>, vector<32x10xf32>
    %cst_159 = arith.constant dense<0.000000e+00> : vector<2x10xf32>
    %373 = tpu.matmul %371, %372, %cst_159 {dimension_numbers = #tpu.dot_dimension_numbers<[1], [0], [0], [1], [0, 0, 1, 1], [], []>} : vector<2x32xf32>, vector<32x10xf32>, vector<2x10xf32> -> vector<2x10xf32>
    %c0_160 = arith.constant 0 : index
    %c0_161 = arith.constant 0 : index
    %374 = vector.load %arg16[%c0_160, %c0_161] : memref<1x10xf32, #tpu.memory_space<vmem>>, vector<1x10xf32>
    %375 = vector.broadcast %374 : vector<1x10xf32> to vector<2x10xf32>
    %376 = arith.addf %373, %375 : vector<2x10xf32>
    %c0_162 = arith.constant 0 : index
    %c0_163 = arith.constant 0 : index
    %377 = vector.load %arg17[%c0_162, %c0_163] : memref<2x10xf32, #tpu.memory_space<vmem>>, vector<2x10xf32>
    tpu.vector_store %arg17[%c0_162, %c0_163], %376 {strides = array<i32>} : memref<2x10xf32, #tpu.memory_space<vmem>>, vector<2x10xf32>,
    return
  }
}

</mosaic_0001>

<bundles_post_ra>
// kernel: transformer_forward.1
= control target key start
LH: loop header
LB: loop body
LE: loop exit
PB: predicated region body
PF: predicated region fallthrough
CT: control target
= control target key end

     0   :  { %s2765_s0 = inlined_call_operand.vmem [shape: f32[2,8,32], index: 0, kind: input, shape index: {}]   ;;  %s2766_s1 = inlined_call_operand.vmem [shape: f32[1,32], index: 1, kind: input, shape index: {}]   ;;  %s2767_s2 = inlined_call_operand.vmem [shape: f32[1,32], index: 2, kind: input, shape index: {}]   ;;  %s2768_s3 = inlined_call_operand.vmem [shape: f32[2,32,96], index: 3, kind: input, shape index: {}]   ;;  %s2769_s4 = inlined_call_operand.vmem [shape: f32[2,1,96], index: 4, kind: input, shape index: {}]   ;;  %s2770_s5 = inlined_call_operand.vmem [shape: f32[2,32,32], index: 5, kind: input, shape index: {}]   ;;  %s2771_s6 = inlined_call_operand.vmem [shape: f32[2,1,32], index: 6, kind: input, shape index: {}]   ;;  %s2772_s7 = inlined_call_operand.vmem [shape: f32[2,1,32], index: 7, kind: input, shape index: {}]   ;;  %s2773_s8 = inlined_call_operand.vmem [shape: f32[2,1,32], index: 8, kind: input, shape index: {}]   ;;  %s2774_s9 = inlined_call_operand.vmem [shape: f32[2,32,64], index: 9, kind: input, shape index: {}]   ;;  %s2775_s10 = inlined_call_operand.vmem [shape: f32[2,1,64], index: 10, kind: input, shape index: {}]   ;;  %s2776_s11 = inlined_call_operand.vmem [shape: f32[2,64,32], index: 11, kind: input, shape index: {}]   ;;  %s2777_s12 = inlined_call_operand.vmem [shape: f32[2,1,32], index: 12, kind: input, shape index: {}]   ;;  %s2778_s13 = inlined_call_operand.vmem [shape: f32[2,1,32], index: 13, kind: input, shape index: {}]   ;;  %s2779_s14 = inlined_call_operand.vmem [shape: f32[2,1,32], index: 14, kind: input, shape index: {}]   ;;  %s2780_s15 = inlined_call_operand.vmem [shape: f32[32,10], index: 15, kind: input, shape index: {}]   ;;  %s2781_s16 = inlined_call_operand.vmem [shape: f32[1,10], index: 16, kind: input, shape index: {}]   ;;  %s2782_s17 = inlined_call_operand.hbm [shape: f32[2,10], index: 17, kind: output, shape index: {}]  }
   0x1   :  { %2796 = sst [smem:[#allocation5_spill]] %s2765_s0 }
   0x2   :  { %2797 = sst [smem:[#allocation6_spill]] %s2766_s1 }
   0x3   :  { %s2798_s26 = sld [smem:[#allocation5_spill]]  ;;  %vm61_vm0 = vcmask 261120  }
   0x9   :  { %v57_v0 = vld [vmem:[%s2798_s26] sm:$0xff]  ;;  %v58_v2 = vld [vmem:[%s2798_s26 + $0x8] sm:$0xff] }
   0xa   :  { %v62_v1 = vsel %vm61_vm0, %v57_v0, 0.0  ;;  %v65_v3 = vsel %vm61_vm0, %v58_v2, 0.0 }
   0xb   :  { %63 = vadd.xlane.f32.xlu0 %v62_v1 }
   0xc   :  { %22 = vsyncpa [#allocation3], 0  ;;  %v2160_v4 = vmov 32.0   ;;  %v126_v21 = vld [vmem:[%s2768_s3 + $0x18] sm:$0xff]  ;;  %v125_v22 = vld [vmem:[%s2768_s3 + $0x10] sm:$0xff]  ;;  %s2799_s24 = sld [smem:[#allocation6_spill]] }
   0xd   :  { %2036 = vrcp.f32 %v2160_v4  ;;  %149 = vmatpush.msra.mxu0 %v126_v21  ;;  %v124_v23 = vld [vmem:[%s2768_s3 + $0x8] sm:$0xff]  ;;  %v123_v24 = vld [vmem:[%s2768_s3] sm:$0xff]  ;;  %s2161_s28 = smov 96   ;;  %s2162_s29 = smov 120   ;;  %vm163_vm8 = vcmask 64512   ;;  %vm713_vm9 = vcmask 130048  }
   0xe   :  { %v2018_v43 = vld [vmem:[%s2767_s2] ss:$0 sm:$0xff]  ;;  %s2163_s0 = smov 88   ;;  %s2790_s30 = smov 104   ;;  %vm716_vm10 = vcmask 195584  }
   0xf   :  { %150 = vmatpush.msra.mxu0 %v125_v22  ;;  %v2019_v53 = vld [vmem:[%s2769_s4] ss:$0 sm:$0xff]  ;;  %s2165_s18 = smov 112   ;;  %s2166_s19 = smov 72  }
  0x10   :  { %s2167_s1 = smov 80   ;;  %s2784_s20 = smov 56  }
  0x11   :  { %151 = vmatpush.msra.mxu0 %v124_v23  ;;  %s2787_s21 = smov 64   ;;  %s2786_s22 = smov 48  }
  0x12   :  { %v2017_v39 = vld [vmem:[%s2799_s24] ss:$0 sm:$0xff]  ;;  %s2785_s23 = smov 40   ;;  %s2788_s24 = smov 8  }
  0x13   :  { %66 = vadd.xlane.f32.xlu0 %v65_v3  ;;  %v2037_v5 = vpop.eup %2036  ;;  %152 = vmatpush.msra.mxu0 %v123_v24  ;;  %s2794_s25 = smov 16   ;;  %s2792_s26 = smov 24  }
  0x14   :  { %v69_v6 = vmul.f32 32.0, %v2037_v5  ;;  %vm73_vm1 = vweird.f32 %v2037_v5 }
  0x16   :  { %v70_v7 = vsub.f32 1.0, %v69_v6 }
  0x18   :  { %v71_v8 = vmul.f32 %v2037_v5, %v70_v7 }
  0x1a   :  { %v72_v9 = vadd.f32 %v2037_v5, %v71_v8 }
  0x1c   :  { %v2274_v10 = vsel %vm73_vm1, %v2037_v5, %v72_v9 }
  0x7e   :  { %v64_v11 = vpop.xlane.xlu0 %63 }
  0x7f   :  { %v75_v12 = vmul.f32 %v2274_v10, %v64_v11 }
  0x81   :  { %v77_v13 = vsub.f32 %v57_v0, %v75_v12 }
  0x83   :  { %v79_v14 = vmul.f32 %v77_v13, %v77_v13 }
  0x85   :  { %v81_v15 = vsel %vm61_vm0, %v79_v14, 0.0 }
  0x86   :  { %82 = vadd.xlane.f32.xlu1 %v81_v15  ;;  %v67_v16 = vpop.xlane.xlu0 %66 }
  0x87   :  { %v76_v17 = vmul.f32 %v2274_v10, %v67_v16 }
  0x89   :  { %v78_v18 = vsub.f32 %v58_v2, %v76_v17 }
  0x8b   :  { %v80_v19 = vmul.f32 %v78_v18, %v78_v18 }
  0x8d   :  { %v84_v20 = vsel %vm61_vm0, %v80_v19, 0.0 }
  0x8e   :  { %85 = vadd.xlane.f32.xlu1 %v84_v20 }
  0xf9   :  { %v83_v25 = vpop.xlane.xlu1 %82 }
  0xfa   :  { %v87_v26 = vmul.f32 %v83_v25, %v2274_v10 }
  0xfc   :  { %v89_v27 = vadd.f32 1e-12, %v87_v26 }
  0xfe   :  { %2038 = vrsqrt.f32 %v89_v27  ;;  %vm97_vm3 = vweird.f32 %v89_v27 }
 0x101   :  { %v86_v28 = vpop.xlane.xlu1 %85 }
 0x102   :  { %v88_v29 = vmul.f32 %v86_v28, %v2274_v10 }
 0x104   :  { %v2039_v30 = vpop.eup %2038  ;;  %v90_v31 = vadd.f32 1e-12, %v88_v29 }
 0x105   :  { %v92_v32 = vmul.f32 %v2039_v30, %v89_v27  ;;  %vm98_vm2 = vweird.f32 %v2039_v30 }
 0x106   :  { %2040 = vrsqrt.f32 %v90_v31  ;;  %vm99_vm4 = vmor %vm97_vm3, %vm98_vm2  ;;  %vm107_vm6 = vweird.f32 %v90_v31  ;;  %vm881_vm2 = vcmask 523264  }
 0x107   :  { %v93_v33 = vmul.f32 %v2039_v30, %v92_v32 }
 0x109   :  { %v94_v34 = vmul.f32 0.5, %v93_v33 }
 0x10b   :  { %v95_v35 = vsub.f32 1.5, %v94_v34 }
 0x10c   :  { %v2041_v36 = vpop.eup %2040 }
 0x10d   :  { %v96_v37 = vmul.f32 %v2039_v30, %v95_v35  ;;  %v102_v38 = vmul.f32 %v2041_v36, %v90_v31  ;;  %vm108_vm5 = vweird.f32 %v2041_v36 }
 0x10e   :  { %vm109_vm7 = vmor %vm107_vm6, %vm108_vm5 }
 0x10f   :  { %v100_v40 = vsel %vm99_vm4, %v2039_v30, %v96_v37  ;;  %v103_v41 = vmul.f32 %v2041_v36, %v102_v38 }
 0x110   :  { %v111_v42 = vmul.f32 %v100_v40, %v77_v13 }
 0x111   :  { %v104_v44 = vmul.f32 0.5, %v103_v41 }
 0x112   :  { %v116_v45 = vmul.f32 %v2017_v39, %v111_v42 }
 0x113   :  { %v105_v46 = vsub.f32 1.5, %v104_v44 }
 0x114   :  { %v2300_v47 = vadd.f32 %v2018_v43, %v116_v45 }
 0x115   :  { %v106_v48 = vmul.f32 %v2041_v36, %v105_v46 }
 0x116   :  { %1878 = vmatmul.msk.f32.vlgmr.msra.gmra.mxu0 %vm61_vm0, %v2300_v47 }
 0x117   :  { %v110_v49 = vsel %vm109_vm7, %v2041_v36, %v106_v48 }
 0x118   :  { %v112_v50 = vmul.f32 %v110_v49, %v78_v18 }
 0x11a   :  { %v117_v51 = vmul.f32 %v2017_v39, %v112_v50 }
 0x11c   :  { %v2304_v52 = vadd.f32 %v2018_v43, %v117_v51 }
 0x11e   :  { %1879 = vmatmul.msk.f32.gmra.mxu0 %vm61_vm0, %v2304_v52 }
 0x193   :  { %v154_v54 = vpop.f32.mrf.mxu0 }
 0x194   :  { %v2311_v55 = vadd.f32 %v2019_v53, %v154_v54 }
 0x196   :  { %161 = vrot.lane.b32.xlu2 %v2311_v55, %s2161_s28 }
 0x19b   :  { %v157_v56 = vpop.f32.mrf.mxu0 }
 0x19c   :  { %v2315_v57 = vadd.f32 %v2019_v53, %v157_v56 }
 0x19e   :  { %319 = vrot.lane.b32.xlu1 %v2315_v57, %s2162_s29  ;;  %321 = vrot.lane.b32.xlu0 %v2315_v57, %s2163_s0  ;;  %v1992_v33 = vpack.i.bf16 %v2315_v57, %v2311_v55 }
 0x19f   :  { %189 = vrot.lane.b32.xlu2 %v2315_v57, %s2161_s28 }
 0x1a6   :  { %555 = vrot.lane.b32.xlu1 %v2311_v55, %s2790_s30  ;;  %423 = vrot.lane.b32.xlu0 %v2311_v55, %s2165_s18 }
 0x1a7   :  { %293 = vrot.lane.b32.xlu2 %v2311_v55, %s2163_s0 }
 0x1ae   :  { %585 = vrot.lane.b32.xlu1 %v2315_v57, %s2166_s19  ;;  %453 = vrot.lane.b32.xlu0 %v2315_v57, %s2167_s1 }
 0x1af   :  { %425 = vrot.lane.b32.xlu2 %v2311_v55, %s2167_s1 }
 0x1b6   :  { %583 = vrot.lane.b32.xlu0 %v2315_v57, %s2790_s30 }
 0x1b7   :  { %291 = vrot.lane.b32.xlu2 %v2311_v55, %s2162_s29 }
 0x1bf   :  { %557 = vrot.lane.b32.xlu2 %v2311_v55, %s2166_s19 }
 0x1c7   :  { %451 = vrot.lane.b32.xlu2 %v2315_v57, %s2165_s18 }
 0x1f0   :  { %v162_v58 = vpop.permute.xlu2 %161 }
 0x1f1   :  { %1880 = vmatpush.xpose.msk.msra.mxu2 %vm163_vm8, %v162_v58 }
 0x1f4   :  { %1881 = vmatmul.msk.f32.vlgmr.msra.gmra.mxu2 %vm163_vm8, %v2311_v55 }
 0x1f9   :  { %v190_v59 = vpop.permute.xlu2 %189 }
 0x1fa   :  { %1882 = vmatpush.xpose.msk.msrb.mxu2 %vm163_vm8, %v190_v59 }
 0x1fd   :  { %1883 = vmatmul.msk.f32.vlgmr.msrb.gmra.mxu2 %vm163_vm8, %v2315_v57 }
 0x201   :  { %v294_v60 = vpop.permute.xlu2 %293 }
 0x202   :  { %1886 = vmatpush.xpose.msk.msra.mxu1 %vm163_vm8, %v294_v60 }
 0x209   :  { %v426_v61 = vpop.permute.xlu2 %425 }
 0x210   :  { %v320_v62 = vpop.permute.xlu1 %319  ;;  %v322_v63 = vpop.permute.xlu0 %321 }
 0x211   :  { %v292_v0 = vpop.permute.xlu2 %291  ;;  %1888 = vmatpush.xpose.msk.msra.mxu2 %vm163_vm8, %v322_v63 }
 0x212   :  { %1887 = vmatmul.msk.f32.vlgmr.msra.gmra.mxu1 %vm163_vm8, %v292_v0 }
 0x214   :  { %1889 = vmatmul.msk.f32.vlgmr.msra.gmra.mxu2 %vm163_vm8, %v320_v62 }
 0x215   :  { %1892 = vmatpush.xpose.msk.msrb.mxu2 %vm163_vm8, %v426_v61 }
 0x218   :  { %v556_v1 = vpop.permute.xlu1 %555  ;;  %v424_v2 = vpop.permute.xlu0 %423 }
 0x219   :  { %v558_v3 = vpop.permute.xlu2 %557 }
 0x21a   :  { %1898 = vmatpush.xpose.msk.msra.mxu2 %vm163_vm8, %v558_v3 }
 0x21c   :  { %1893 = vmatmul.msk.f32.vlgmr.msrb.gmra.mxu2 %vm163_vm8, %v424_v2 }
 0x220   :  { %v586_v4 = vpop.permute.xlu1 %585  ;;  %v454_v5 = vpop.permute.xlu0 %453 }
 0x221   :  { %1894 = vmatpush.xpose.msk.msrb.mxu0 %vm163_vm8, %v454_v5  ;;  %v452_v6 = vpop.permute.xlu2 %451 }
 0x224   :  { %1895 = vmatmul.msk.f32.vlgmr.msrb.gmra.mxu0 %vm163_vm8, %v452_v6  ;;  %1899 = vmatmul.msk.f32.vlgmr.msra.gmra.mxu2 %vm163_vm8, %v556_v1 }
 0x225   :  { %1900 = vmatpush.xpose.msk.msra.mxu0 %vm163_vm8, %v586_v4 }
 0x228   :  { %v584_v7 = vpop.permute.xlu0 %583 }
 0x22c   :  { %1901 = vmatmul.msk.f32.vlgmr.msra.gmra.mxu0 %vm163_vm8, %v584_v7 }
 0x277   :  { %v185_v8 = vpop.f32.mrf.mxu2 }
 0x278   :  { %v215_v9 = vmul.f32 0.35355338, %v185_v8 }
 0x27a   :  { %v217_v11 = vsel %vm163_vm8, %v215_v9, -inf }
 0x27b   :  { %218 = vmax.xlane.f32.xlu2 %v217_v11 }
 0x280   :  { %v212_v12 = vpop.f32.mrf.mxu2 }
 0x281   :  { %v216_v13 = vmul.f32 0.35355338, %v212_v12 }
 0x283   :  { %v220_v14 = vsel %vm163_vm8, %v216_v13, -inf }
 0x284   :  { %221 = vmax.xlane.f32.xlu1 %v220_v14 }
 0x28f   :  { %v316_v15 = vpop.f32.mrf.mxu1 }
 0x290   :  { %v347_v16 = vmul.f32 0.35355338, %v316_v15 }
 0x292   :  { %v349_v17 = vsel %vm163_vm8, %v347_v16, -inf }
 0x293   :  { %350 = vmax.xlane.f32.xlu0 %v349_v17 }
 0x297   :  { %v344_v18 = vpop.f32.mrf.mxu2 }
 0x298   :  { %v348_v31 = vmul.f32 0.35355338, %v344_v18 }
 0x29a   :  { %v352_v32 = vsel %vm163_vm8, %v348_v31, -inf }
 0x29f   :  { %v448_v19 = vpop.f32.mrf.mxu2 }
 0x2a0   :  { %v479_v24 = vmul.f32 0.35355338, %v448_v19 }
 0x2a1   :  { %v476_v20 = vpop.f32.mrf.mxu0 }
 0x2a2   :  { %v480_v21 = vmul.f32 0.35355338, %v476_v20  ;;  %v481_v30 = vsel %vm163_vm8, %v479_v24, -inf }
 0x2a4   :  { %v484_v22 = vsel %vm163_vm8, %v480_v21, -inf }
 0x2a5   :  { %485 = vmax.xlane.f32.xlu2 %v484_v22 }
 0x2a7   :  { %v580_v23 = vpop.f32.mrf.mxu2 }
 0x2a8   :  { %v2365_v25 = vmul.f32 0.35355338, %v580_v23 }
 0x2a9   :  { %v608_v26 = vpop.f32.mrf.mxu0 }
 0x2aa   :  { %v612_v27 = vmul.f32 0.35355338, %v608_v26  ;;  %v613_v28 = vsel %vm163_vm8, %v2365_v25, -inf }
 0x2ab   :  { %614 = vmax.xlane.f32.xlu0 %v613_v28 }
 0x2ac   :  { %v616_v29 = vsel %vm163_vm8, %v612_v27, -inf }
 0x2ad   :  { %617 = vmax.xlane.f32.xlu1 %v616_v29  ;;  %482 = vmax.xlane.f32.xlu2 %v481_v30 }
 0x2b5   :  { %353 = vmax.xlane.f32.xlu1 %v352_v32 }
 0x2bf   :  { %1993 = vrot.lane.b32.xlu0 %v1992_v33, %s2784_s20  ;;  %s2807_s20 = smov 24  }
 0x2ce   :  { %1988 = vrot.lane.b32.xlu1 %v1992_v33, %s2787_s21 }
 0x2d6   :  { %503 = vrot.lane.b32.xlu1 %v2311_v55, %s2786_s22 }
 0x2ee   :  { %v219_v34 = vpop.xlane.xlu2 %218 }
 0x2ef   :  { %v223_v37 = vsub.f32 %v215_v9, %v219_v34 }
 0x2f1   :  { %v225_v39 = vmul.f32 1.442695, %v223_v37 }
 0x2f7   :  { %v222_v43 = vpop.xlane.xlu1 %221 }
 0x2f8   :  { %v224_v48 = vsub.f32 %v216_v13, %v222_v43 }
 0x2fa   :  { %v227_v50 = vmul.f32 1.442695, %v224_v48 }
 0x306   :  { %v351_v35 = vpop.xlane.xlu0 %350 }
 0x307   :  { %v355_v36 = vsub.f32 %v347_v16, %v351_v35 }
 0x309   :  { %v357_v38 = vmul.f32 1.442695, %v355_v36 }
 0x30b   :  { %2042 = vpow2.f32 %v357_v38 }
 0x30c   :  { %2044 = vpow2.f32 %v225_v39 }
 0x311   :  { %v2378_v40 = vpop.eup %2042 }
 0x312   :  { %v361_v41 = vsel %vm163_vm8, %v2378_v40, 0.0  ;;  %v2045_v42 = vpop.eup %2044 }
 0x313   :  { %362 = vadd.xlane.f32.xlu0 %v361_v41  ;;  %v229_v46 = vsel %vm163_vm8, %v2045_v42, 0.0 }
 0x318   :  { %v486_v44 = vpop.xlane.xlu2 %485 }
 0x319   :  { %v488_v45 = vsub.f32 %v480_v21, %v486_v44 }
 0x31b   :  { %v491_v49 = vmul.f32 1.442695, %v488_v45  ;;  %230 = vadd.xlane.f32.xlu0 %v229_v46 }
 0x31d   :  { %2046 = vpow2.f32 %v491_v49 }
 0x31e   :  { %2048 = vpow2.f32 %v227_v50  ;;  %v615_v62 = vpop.xlane.xlu0 %614 }
 0x31f   :  { %v619_v9 = vsub.f32 %v2365_v25, %v615_v62  ;;  %v719_v62 = vld [vmem:[%s2770_s5] sm:$0xff] }
 0x320   :  { %v618_v51 = vpop.xlane.xlu1 %617  ;;  %v483_v59 = vpop.xlane.xlu2 %482 }
 0x321   :  { %v620_v53 = vsub.f32 %v612_v27, %v618_v51  ;;  %v487_v1 = vsub.f32 %v479_v24, %v483_v59  ;;  %v621_v12 = vmul.f32 1.442695, %v619_v9  ;;  %v722_v59 = vld [vmem:[%s2770_s5 + $0x18] sm:$0xff] }
 0x322   :  { %745 = vmatpush.msrb.mxu2 %v722_v59 }
 0x323   :  { %v2383_v54 = vpop.eup %2046  ;;  %v623_v56 = vmul.f32 1.442695, %v620_v53  ;;  %v489_v5 = vmul.f32 1.442695, %v487_v1 }
 0x324   :  { %v496_v58 = vsel %vm163_vm8, %v2383_v54, 0.0  ;;  %v2049_v61 = vpop.eup %2048 }
 0x325   :  { %2050 = vpow2.f32 %v623_v56  ;;  %497 = vadd.xlane.f32.xlu2 %v496_v58  ;;  %v232_v4 = vsel %vm163_vm8, %v2049_v61, 0.0 }
 0x328   :  { %v354_v60 = vpop.xlane.xlu1 %353 }
 0x329   :  { %v356_v63 = vsub.f32 %v348_v31, %v354_v60  ;;  %v721_v60 = vld [vmem:[%s2770_s5 + $0x10] sm:$0xff] }
 0x32a   :  { %746 = vmatpush.msrb.mxu2 %v721_v60 }
 0x32b   :  { %v2387_v0 = vpop.eup %2050  ;;  %v359_v2 = vmul.f32 1.442695, %v356_v63 }
 0x32c   :  { %v628_v3 = vsel %vm163_vm8, %v2387_v0, 0.0 }
 0x32d   :  { %2052 = vpow2.f32 %v359_v2  ;;  %629 = vadd.xlane.f32.xlu1 %v628_v3  ;;  %233 = vadd.xlane.f32.xlu2 %v232_v4 }
 0x32e   :  { %2054 = vpow2.f32 %v489_v5 }
 0x32f   :  { %635 = vrot.lane.b32.xlu0 %v2311_v55, %s2785_s23  ;;  %2056 = vpow2.f32 %v621_v12  ;;  %v2020_v12 = vld [vmem:[%s2771_s6] ss:$0 sm:$0xff] }
 0x331   :  { %v1994_v6 = vpop.permute.xlu0 %1993 }
 0x332   :  { %v1996_v7 = vunpack.i.h.bf16 %v1994_v6  ;;  %v1995_v23 = vunpack.i.l.bf16 %v1994_v6 }
 0x333   :  { %v2053_v8 = vpop.eup %2052 }
 0x334   :  { %418 = vmatpush.msrb.mxu1 %v1996_v7  ;;  %v364_v11 = vsel %vm163_vm8, %v2053_v8, 0.0  ;;  %v2055_v13 = vpop.eup %2054 }
 0x335   :  { %365 = vadd.xlane.f32.xlu2 %v364_v11  ;;  %v493_v14 = vsel %vm163_vm8, %v2055_v13, 0.0  ;;  %v2057_v15 = vpop.eup %2056 }
 0x336   :  { %v625_v18 = vsel %vm163_vm8, %v2057_v15, 0.0 }
 0x337   :  { %661 = vrot.lane.b32.xlu0 %v2315_v57, %s2785_s23 }
 0x33d   :  { %494 = vadd.xlane.f32.xlu2 %v493_v14 }
 0x340   :  { %v1989_v55 = vpop.permute.xlu1 %1988 }
 0x341   :  { %v1990_v16 = vunpack.i.l.bf16 %v1989_v55  ;;  %v1991_v17 = vunpack.i.h.bf16 %v1989_v55 }
 0x343   :  { %260 = vmatpush.msra.mxu3 %v1990_v16 }
 0x345   :  { %286 = vmatpush.msrb.mxu3 %v1991_v17  ;;  %626 = vadd.xlane.f32.xlu2 %v625_v18 }
 0x348   :  { %v504_v29 = vpop.permute.xlu1 %503 }
 0x35d   :  { %529 = vrot.lane.b32.xlu2 %v2315_v57, %s2786_s22 }
 0x386   :  { %v363_v19 = vpop.xlane.xlu0 %362 }
 0x38e   :  { %v231_v20 = vpop.xlane.xlu0 %230 }
 0x38f   :  { %2058 = vrcp.f32 %v231_v20 }
 0x395   :  { %v2059_v21 = vpop.eup %2058 }
 0x396   :  { %v237_v22 = vmul.f32 %v2059_v21, %v2045_v42 }
 0x398   :  { %1884 = vmatmul.msk.f32.vlgmr.msra.gmra.mxu3 %vm163_vm8, %v237_v22  ;;  %v498_v24 = vpop.xlane.xlu2 %497 }
 0x399   :  { %392 = vmatpush.msra.mxu3 %v1995_v23 }
 0x3a0   :  { %v234_v25 = vpop.xlane.xlu2 %233  ;;  %v630_v38 = vpop.xlane.xlu1 %629 }
 0x3a1   :  { %2060 = vrcp.f32 %v234_v25  ;;  %v636_v34 = vpop.permute.xlu0 %635 }
 0x3a2   :  { %2062 = vrcp.f32 %v363_v19 }
 0x3a7   :  { %v2061_v26 = vpop.eup %2060 }
 0x3a8   :  { %v366_v27 = vpop.xlane.xlu2 %365  ;;  %v238_v28 = vmul.f32 %v2061_v26, %v2049_v61  ;;  %v2063_v57 = vpop.eup %2062  ;;  %v720_v61 = vld [vmem:[%s2770_s5 + $0x8] sm:$0xff] }
 0x3a9   :  { %2064 = vrcp.f32 %v366_v27  ;;  %v369_v33 = vmul.f32 %v2063_v57, %v2378_v40  ;;  %v662_v44 = vpop.permute.xlu0 %661  ;;  %747 = vmatpush.msrb.mxu2 %v720_v61  ;;  %v815_v57 = vld [vmem:[%s2774_s9 + $0x8] sm:$0xff] }
 0x3aa   :  { %1885 = vmatmul.msk.f32.vlgmr.msrb.gmra.mxu3 %vm163_vm8, %v238_v28 }
 0x3ab   :  { %524 = vmatpush.msrb.mxu3 %v504_v29  ;;  %748 = vmatpush.msrb.mxu2 %v719_v62  ;;  %v816_v29 = vld [vmem:[%s2774_s9 + $0x10] sm:$0xff] }
 0x3af   :  { %v2065_v30 = vpop.eup %2064 }
 0x3b0   :  { %v495_v31 = vpop.xlane.xlu2 %494  ;;  %v370_v32 = vmul.f32 %v2065_v30, %v2053_v8  ;;  %v814_v30 = vld [vmem:[%s2774_s9] sm:$0xff] }
 0x3b1   :  { %2066 = vrcp.f32 %v495_v31 }
 0x3b2   :  { %1891 = vmatmul.msk.f32.vlgmr.msrb.gmra.mxu1 %vm163_vm8, %v370_v32  ;;  %1890 = vmatmul.msk.f32.vlgmr.msra.gmra.mxu3 %vm163_vm8, %v369_v33  ;;  %2068 = vrcp.f32 %v498_v24 }
 0x3b3   :  { %656 = vmatpush.msra.mxu3 %v636_v34 }
 0x3b7   :  { %v2067_v35 = vpop.eup %2066 }
 0x3b8   :  { %v501_v36 = vmul.f32 %v2067_v35, %v2055_v13  ;;  %v627_v37 = vpop.xlane.xlu2 %626  ;;  %v2069_v39 = vpop.eup %2068 }
 0x3b9   :  { %2070 = vrcp.f32 %v627_v37  ;;  %v502_v40 = vmul.f32 %v2069_v39, %v2383_v54 }
 0x3ba   :  { %1896 = vmatmul.msk.f32.vlgmr.msrb.gmra.mxu3 %vm163_vm8, %v501_v36  ;;  %2072 = vrcp.f32 %v630_v38 }
 0x3bf   :  { %v2071_v41 = vpop.eup %2070 }
 0x3c0   :  { %v633_v42 = vmul.f32 %v2071_v41, %v2057_v15  ;;  %v530_v43 = vpop.permute.xlu2 %529  ;;  %v2073_v45 = vpop.eup %2072 }
 0x3c1   :  { %550 = vmatpush.msra.mxu1 %v530_v43  ;;  %v634_v46 = vmul.f32 %v2073_v45, %v2387_v0  ;;  %v2021_v43 = vld [vmem:[%s2772_s7] ss:$0 sm:$0xff] }
 0x3c2   :  { %1897 = vmatmul.msk.f32.vlgmr.msra.gmra.mxu1 %vm163_vm8, %v502_v40  ;;  %1902 = vmatmul.msk.f32.vlgmr.msra.gmra.mxu3 %vm163_vm8, %v633_v42 }
 0x3c3   :  { %682 = vmatpush.msrb.mxu1 %v662_v44 }
 0x3ca   :  { %1903 = vmatmul.msk.f32.vlgmr.msrb.gmra.mxu1 %vm163_vm8, %v634_v46  ;;  %v2022_v46 = vld [vmem:[%s2773_s8] ss:$0 sm:$0xff] }
 0x41b   :  { %v262_v48 = vpop.f32.mrf.mxu3 }
 0x42d   :  { %v288_v49 = vpop.f32.mrf.mxu3 }
 0x42f   :  { %v420_v51 = vpop.f32.mrf.mxu1 }
 0x435   :  { %v394_v50 = vpop.f32.mrf.mxu3 }
 0x436   :  { %689 = vrot.lane.b32.xlu0 %v394_v50, %s2788_s24 }
 0x43d   :  { %v526_v53 = vpop.f32.mrf.mxu3 }
 0x43e   :  { %697 = vrot.lane.b32.xlu0 %v526_v53, %s2794_s25 }
 0x43f   :  { %v552_v54 = vpop.f32.mrf.mxu1 }
 0x445   :  { %v658_v56 = vpop.f32.mrf.mxu3 }
 0x446   :  { %691 = vrot.lane.b32.xlu0 %v420_v51, %s2788_s24  ;;  %705 = vrot.lane.b32.xlu2 %v658_v56, %s2792_s26 }
 0x447   :  { %v684_v58 = vpop.f32.mrf.mxu1 }
 0x44e   :  { %699 = vrot.lane.b32.xlu2 %v552_v54, %s2794_s25  ;;  %707 = vrot.lane.b32.xlu0 %v684_v58, %s2792_s26  ;;  %s2175_s25 = smov [#allocation2]  }
 0x4a0   :  { %v706_v2 = vpop.permute.xlu2 %705 }
 0x4a8   :  { %v690_v63 = vpop.permute.xlu0 %689  ;;  %v700_v7 = vpop.permute.xlu2 %699 }
 0x4a9   :  { %v711_v0 = vsel %vm163_vm8, %v262_v48, %v690_v63  ;;  %v876_v63 = vld [vmem:[%s2776_s11 + $0x38] sm:$0xff] }
 0x4aa   :  { %896 = vmatpush.msrb.mxu3 %v876_v63 }
 0x4b0   :  { %v698_v1 = vpop.permute.xlu0 %697 }
 0x4b1   :  { %v714_v3 = vsel %vm713_vm9, %v711_v0, %v698_v1  ;;  %v875_v0 = vld [vmem:[%s2776_s11 + $0x30] sm:$0xff]  ;;  %v874_v1 = vld [vmem:[%s2776_s11 + $0x28] sm:$0xff] }
 0x4b2   :  { %v717_v4 = vsel %vm716_vm10, %v714_v3, %v706_v2  ;;  %897 = vmatpush.msrb.mxu3 %v875_v0  ;;  %v873_v2 = vld [vmem:[%s2776_s11 + $0x20] sm:$0xff]  ;;  %v872_v3 = vld [vmem:[%s2776_s11 + $0x18] sm:$0xff] }
 0x4b3   :  { %1904 = vmatmul.msk.f32.vlgmr.msrb.gmra.mxu2 %vm61_vm0, %v717_v4  ;;  %v871_v4 = vld [vmem:[%s2776_s11 + $0x10] sm:$0xff] }
 0x4b4   :  { %898 = vmatpush.msrb.mxu3 %v874_v1 }
 0x4b6   :  { %899 = vmatpush.msrb.mxu3 %v873_v2  ;;  %v2025_v2 = vld [vmem:[%s2778_s13] ss:$0 sm:$0xff] }
 0x4b8   :  { %v692_v5 = vpop.permute.xlu0 %691  ;;  %900 = vmatpush.msrb.mxu3 %v872_v3 }
 0x4b9   :  { %v712_v6 = vsel %vm163_vm8, %v288_v49, %v692_v5  ;;  %v870_v5 = vld [vmem:[%s2776_s11 + $0x8] sm:$0xff] }
 0x4ba   :  { %v715_v9 = vsel %vm713_vm9, %v712_v6, %v700_v7  ;;  %901 = vmatpush.msrb.mxu3 %v871_v4  ;;  %v869_v6 = vld [vmem:[%s2776_s11] sm:$0xff] }
 0x4bb   :  { %v2023_v7 = vld [vmem:[%s2775_s10] ss:$0 sm:$0xff] }
 0x4bc   :  { %902 = vmatpush.msrb.mxu3 %v870_v5  ;;  %v2026_v5 = vld [vmem:[%s2779_s14] ss:$0 sm:$0xff] }
 0x4be   :  { %903 = vmatpush.msrb.mxu3 %v869_v6 }
 0x4c0   :  { %v708_v8 = vpop.permute.xlu0 %707 }
 0x4c1   :  { %v718_v11 = vsel %vm716_vm10, %v715_v9, %v708_v8 }
 0x4c2   :  { %1905 = vmatmul.msk.f32.gmra.mxu2 %vm61_vm0, %v718_v11 }
 0x536   :  { %v750_v13 = vpop.f32.mrf.mxu2 }
 0x537   :  { %v751_v14 = vadd.f32 %v2020_v12, %v750_v13 }
 0x539   :  { %v756_v55 = vadd.f32 %v751_v14, %v2300_v47 }
 0x53b   :  { %v760_v15 = vsel %vm61_vm0, %v756_v55, 0.0 }
 0x53c   :  { %761 = vadd.xlane.f32.xlu1 %v760_v15 }
 0x545   :  { %v753_v16 = vpop.f32.mrf.mxu2 }
 0x546   :  { %v754_v17 = vadd.f32 %v2020_v12, %v753_v16 }
 0x548   :  { %v757_v18 = vadd.f32 %v754_v17, %v2304_v52  ;;  %v817_v52 = vld [vmem:[%s2774_s9 + $0x18] sm:$0xff] }
 0x549   :  { %840 = vmatpush.msrb.mxu0 %v817_v52  ;;  %v2024_v52 = vld [vmem:[%s2777_s12] ss:$0 sm:$0xff] }
 0x54a   :  { %v763_v19 = vsel %vm61_vm0, %v757_v18, 0.0 }
 0x54b   :  { %764 = vadd.xlane.f32.xlu2 %v763_v19  ;;  %841 = vmatpush.msrb.mxu0 %v816_v29 }
 0x54d   :  { %842 = vmatpush.msrb.mxu0 %v815_v57 }
 0x54f   :  { %843 = vmatpush.msrb.mxu0 %v814_v30 }
 0x5af   :  { %v762_v20 = vpop.xlane.xlu1 %761 }
 0x5b0   :  { %v766_v21 = vmul.f32 %v762_v20, %v2274_v10 }
 0x5b2   :  { %v768_v22 = vsub.f32 %v756_v55, %v766_v21 }
 0x5b4   :  { %v770_v23 = vmul.f32 %v768_v22, %v768_v22 }
 0x5b6   :  { %v772_v24 = vsel %vm61_vm0, %v770_v23, 0.0 }
 0x5b7   :  { %773 = vadd.xlane.f32.xlu0 %v772_v24 }
 0x5be   :  { %v765_v25 = vpop.xlane.xlu2 %764 }
 0x5bf   :  { %v767_v47 = vmul.f32 %v765_v25, %v2274_v10 }
 0x5c1   :  { %v769_v26 = vsub.f32 %v757_v18, %v767_v47 }
 0x5c3   :  { %v771_v27 = vmul.f32 %v769_v26, %v769_v26 }
 0x5c5   :  { %v775_v28 = vsel %vm61_vm0, %v771_v27, 0.0 }
 0x5c6   :  { %776 = vadd.xlane.f32.xlu1 %v775_v28 }
 0x62a   :  { %v774_v31 = vpop.xlane.xlu0 %773 }
 0x62b   :  { %v778_v32 = vmul.f32 %v774_v31, %v2274_v10 }
 0x62d   :  { %v780_v33 = vadd.f32 1e-12, %v778_v32 }
 0x62f   :  { %2074 = vrsqrt.f32 %v780_v33  ;;  %vm788_vm12 = vweird.f32 %v780_v33 }
 0x635   :  { %v2075_v34 = vpop.eup %2074 }
 0x636   :  { %v783_v35 = vmul.f32 %v2075_v34, %v780_v33  ;;  %vm789_vm11 = vweird.f32 %v2075_v34 }
 0x637   :  { %vm790_vm13 = vmor %vm788_vm12, %vm789_vm11 }
 0x638   :  { %v784_v36 = vmul.f32 %v2075_v34, %v783_v35 }
 0x639   :  { %v777_v37 = vpop.xlane.xlu1 %776 }
 0x63a   :  { %v785_v38 = vmul.f32 0.5, %v784_v36  ;;  %v779_v39 = vmul.f32 %v777_v37, %v2274_v10 }
 0x63c   :  { %v786_v41 = vsub.f32 1.5, %v785_v38  ;;  %v781_v40 = vadd.f32 1e-12, %v779_v39 }
 0x63e   :  { %v787_v42 = vmul.f32 %v2075_v34, %v786_v41  ;;  %2076 = vrsqrt.f32 %v781_v40  ;;  %vm798_vm15 = vweird.f32 %v781_v40 }
 0x640   :  { %v791_v44 = vsel %vm790_vm13, %v2075_v34, %v787_v42 }
 0x641   :  { %v802_v45 = vmul.f32 %v791_v44, %v768_v22 }
 0x643   :  { %v807_v48 = vmul.f32 %v2021_v43, %v802_v45 }
 0x644   :  { %v2077_v49 = vpop.eup %2076 }
 0x645   :  { %v793_v50 = vmul.f32 %v2077_v49, %v781_v40  ;;  %v812_v51 = vadd.f32 %v2022_v46, %v807_v48  ;;  %vm799_vm14 = vweird.f32 %v2077_v49  ;;  %v1912_v48 = vld [vmem:[%s2768_s3 + $0x30] sm:$0xff] }
 0x646   :  { %vm800_vm1 = vmor %vm798_vm15, %vm799_vm14 }
 0x647   :  { %v794_v53 = vmul.f32 %v2077_v49, %v793_v50  ;;  %1906 = vmatmul.msk.f32.vlgmr.msrb.gmra.mxu0 %vm61_vm0, %v812_v51  ;;  %v1910_v50 = vld [vmem:[%s2768_s3 + $0x20] sm:$0xff] }
 0x649   :  { %v795_v54 = vmul.f32 0.5, %v794_v53 }
 0x64b   :  { %v796_v56 = vsub.f32 1.5, %v795_v54 }
 0x64d   :  { %v797_v58 = vmul.f32 %v2077_v49, %v796_v56 }
 0x64f   :  { %v801_v59 = vsel %vm800_vm1, %v2077_v49, %v797_v58  ;;  %v1911_v49 = vld [vmem:[%s2768_s3 + $0x28] sm:$0xff] }
 0x650   :  { %v803_v60 = vmul.f32 %v801_v59, %v769_v26 }
 0x652   :  { %v808_v61 = vmul.f32 %v2021_v43, %v803_v60 }
 0x654   :  { %v813_v62 = vadd.f32 %v2022_v46, %v808_v61  ;;  %v1913_v46 = vld [vmem:[%s2768_s3 + $0x38] sm:$0xff] }
 0x655   :  { %997 = vmatpush.msra.mxu1 %v1913_v46 }
 0x656   :  { %1907 = vmatmul.msk.f32.gmra.mxu0 %vm61_vm0, %v813_v62 }
 0x657   :  { %998 = vmatpush.msra.mxu1 %v1912_v48 }
 0x659   :  { %999 = vmatpush.msra.mxu1 %v1911_v49 }
 0x65b   :  { %1000 = vmatpush.msra.mxu1 %v1910_v50 }
 0x6c4   :  { %v845_v8 = vpop.f32.mrf.mxu0 }
 0x6c5   :  { %v846_v9 = vadd.f32 %v2023_v7, %v845_v8 }
 0x6c7   :  { %v853_v11 = vmul.f32 0.044715, %v846_v9  ;;  %v851_v19 = vmul.f32 0.5, %v846_v9 }
 0x6c9   :  { %v855_v12 = vmul.f32 %v853_v11, %v846_v9 }
 0x6cb   :  { %v857_v13 = vmul.f32 %v855_v12, %v846_v9 }
 0x6cd   :  { %v859_v14 = vadd.f32 %v857_v13, %v846_v9 }
 0x6cf   :  { %v861_v55 = vmul.f32 0.7978846, %v859_v14 }
 0x6d1   :  { %2078 = vtanh.f32 %v861_v55 }
 0x6d3   :  { %v848_v15 = vpop.f32.mrf.mxu0 }
 0x6d4   :  { %v849_v16 = vadd.f32 %v2023_v7, %v848_v15 }
 0x6d6   :  { %v854_v17 = vmul.f32 0.044715, %v849_v16  ;;  %v852_v26 = vmul.f32 0.5, %v849_v16 }
 0x6d7   :  { %v2079_v18 = vpop.eup %2078 }
 0x6d8   :  { %v865_v20 = vadd.f32 1.0, %v2079_v18  ;;  %v856_v21 = vmul.f32 %v854_v17, %v849_v16  ;;  %v2027_v18 = vld [vmem:[%s2769_s4 + $0x1] ss:$0 sm:$0xff]  ;;  %s2800_s4 = smov 104  }
 0x6da   :  { %v867_v22 = vmul.f32 %v865_v20, %v851_v19  ;;  %v858_v23 = vmul.f32 %v856_v21, %v849_v16 }
 0x6dc   :  { %1908 = vmatmul.msk.f32.vlgmr.msrb.gmra.mxu3 %vm881_vm2, %v867_v22  ;;  %v860_v24 = vadd.f32 %v858_v23, %v849_v16 }
 0x6de   :  { %v862_v25 = vmul.f32 0.7978846, %v860_v24 }
 0x6e0   :  { %2080 = vtanh.f32 %v862_v25 }
 0x6e6   :  { %v2081_v47 = vpop.eup %2080 }
 0x6e7   :  { %v866_v27 = vadd.f32 1.0, %v2081_v47 }
 0x6e9   :  { %v868_v28 = vmul.f32 %v866_v27, %v852_v26 }
 0x6eb   :  { %1909 = vmatmul.msk.f32.gmra.mxu3 %vm881_vm2, %v868_v28 }
 0x75f   :  { %v905_v29 = vpop.f32.mrf.mxu3 }
 0x760   :  { %v906_v57 = vadd.f32 %v2024_v52, %v905_v29 }
 0x762   :  { %v911_v30 = vadd.f32 %v906_v57, %v812_v51 }
 0x764   :  { %v915_v31 = vsel %vm61_vm0, %v911_v30, 0.0 }
 0x765   :  { %916 = vadd.xlane.f32.xlu1 %v915_v31 }
 0x76e   :  { %v908_v32 = vpop.f32.mrf.mxu3 }
 0x76f   :  { %v909_v33 = vadd.f32 %v2024_v52, %v908_v32 }
 0x771   :  { %v912_v34 = vadd.f32 %v909_v33, %v813_v62 }
 0x773   :  { %v918_v35 = vsel %vm61_vm0, %v912_v34, 0.0 }
 0x774   :  { %919 = vadd.xlane.f32.xlu1 %v918_v35 }
 0x7d8   :  { %v917_v36 = vpop.xlane.xlu1 %916 }
 0x7d9   :  { %v921_v37 = vmul.f32 %v917_v36, %v2274_v10 }
 0x7db   :  { %v923_v38 = vsub.f32 %v911_v30, %v921_v37 }
 0x7dd   :  { %v925_v39 = vmul.f32 %v923_v38, %v923_v38 }
 0x7df   :  { %v927_v41 = vsel %vm61_vm0, %v925_v39, 0.0 }
 0x7e0   :  { %928 = vadd.xlane.f32.xlu1 %v927_v41 }
 0x7e7   :  { %v920_v40 = vpop.xlane.xlu1 %919 }
 0x7e8   :  { %v922_v42 = vmul.f32 %v920_v40, %v2274_v10 }
 0x7ea   :  { %v924_v43 = vsub.f32 %v912_v34, %v922_v42 }
 0x7ec   :  { %v926_v44 = vmul.f32 %v924_v43, %v924_v43 }
 0x7ee   :  { %v930_v45 = vsel %vm61_vm0, %v926_v44, 0.0 }
 0x7ef   :  { %931 = vadd.xlane.f32.xlu1 %v930_v45 }
 0x853   :  { %v929_v51 = vpop.xlane.xlu1 %928 }
 0x854   :  { %v933_v53 = vmul.f32 %v929_v51, %v2274_v10 }
 0x856   :  { %v935_v54 = vadd.f32 1e-12, %v933_v53 }
 0x858   :  { %2082 = vrsqrt.f32 %v935_v54  ;;  %vm943_vm4 = vweird.f32 %v935_v54 }
 0x85e   :  { %v2083_v56 = vpop.eup %2082 }
 0x85f   :  { %v938_v58 = vmul.f32 %v2083_v56, %v935_v54  ;;  %vm944_vm3 = vweird.f32 %v2083_v56 }
 0x860   :  { %vm945_vm5 = vmor %vm943_vm4, %vm944_vm3 }
 0x861   :  { %v939_v59 = vmul.f32 %v2083_v56, %v938_v58 }
 0x862   :  { %v932_v60 = vpop.xlane.xlu1 %931 }
 0x863   :  { %v940_v61 = vmul.f32 0.5, %v939_v59  ;;  %v934_v62 = vmul.f32 %v932_v60, %v2274_v10 }
 0x865   :  { %v941_v63 = vsub.f32 1.5, %v940_v61  ;;  %v936_v0 = vadd.f32 1e-12, %v934_v62 }
 0x867   :  { %v942_v1 = vmul.f32 %v2083_v56, %v941_v63  ;;  %2084 = vrsqrt.f32 %v936_v0  ;;  %vm953_vm7 = vweird.f32 %v936_v0 }
 0x869   :  { %v946_v3 = vsel %vm945_vm5, %v2083_v56, %v942_v1 }
 0x86a   :  { %v957_v4 = vmul.f32 %v946_v3, %v923_v38 }
 0x86c   :  { %v962_v6 = vmul.f32 %v2025_v2, %v957_v4 }
 0x86d   :  { %v2085_v7 = vpop.eup %2084 }
 0x86e   :  { %v948_v8 = vmul.f32 %v2085_v7, %v936_v0  ;;  %v2530_v9 = vadd.f32 %v2026_v5, %v962_v6  ;;  %vm954_vm6 = vweird.f32 %v2085_v7 }
 0x86f   :  { %vm955_vm11 = vmor %vm953_vm7, %vm954_vm6  ;;  %vm1836_vm6 = vcmask 1041409   ;;  %vm1860_vm7 = vcmask 74752  }
 0x870   :  { %v949_v11 = vmul.f32 %v2085_v7, %v948_v8  ;;  %1915 = vmatmul.msk.f32.vlgmr.msra.gmra.mxu1 %vm61_vm0, %v2530_v9 }
 0x872   :  { %v950_v12 = vmul.f32 0.5, %v949_v11 }
 0x874   :  { %v951_v13 = vsub.f32 1.5, %v950_v12 }
 0x876   :  { %v952_v14 = vmul.f32 %v2085_v7, %v951_v13 }
 0x878   :  { %v956_v55 = vsel %vm955_vm11, %v2085_v7, %v952_v14 }
 0x879   :  { %v958_v15 = vmul.f32 %v956_v55, %v924_v43 }
 0x87b   :  { %v963_v16 = vmul.f32 %v2025_v2, %v958_v15 }
 0x87d   :  { %v2534_v17 = vadd.f32 %v2026_v5, %v963_v16 }
 0x87f   :  { %1916 = vmatmul.msk.f32.gmra.mxu1 %vm61_vm0, %v2534_v17 }
 0x8ed   :  { %v1002_v19 = vpop.f32.mrf.mxu1 }
 0x8ee   :  { %v2541_v20 = vadd.f32 %v2027_v18, %v1002_v19 }
 0x8f0   :  { %1009 = vrot.lane.b32.xlu2 %v2541_v20, %s2161_s28 }
 0x8f8   :  { %1140 = vrot.lane.b32.xlu2 %v2541_v20, %s2163_s0 }
 0x8fc   :  { %v1005_v21 = vpop.f32.mrf.mxu1 }
 0x8fd   :  { %v2547_v22 = vadd.f32 %v2027_v18, %v1005_v21 }
 0x8ff   :  { %1168 = vrot.lane.b32.xlu1 %v2547_v22, %s2163_s0  ;;  %1036 = vrot.lane.b32.xlu0 %v2547_v22, %s2161_s28  ;;  %v1997_v62 = vpack.i.bf16 %v2547_v22, %v2541_v20  ;;  %s2801_s28 = smov 64   ;;  %s2803_s0 = smov 40  }
 0x900   :  { %1298 = vrot.lane.b32.xlu2 %v2547_v22, %s2165_s18 }
 0x907   :  { %1138 = vrot.lane.b32.xlu1 %v2541_v20, %s2162_s29  ;;  %1166 = vrot.lane.b32.xlu0 %v2547_v22, %s2162_s29  ;;  %s2802_s29 = smov 48  }
 0x908   :  { %1432 = vrot.lane.b32.xlu2 %v2547_v22, %s2166_s19 }
 0x90f   :  { %1272 = vrot.lane.b32.xlu1 %v2541_v20, %s2167_s1  ;;  %1300 = vrot.lane.b32.xlu0 %v2547_v22, %s2167_s1  ;;  %s2806_s1 = smov 16  }
 0x910   :  { %1402 = vrot.lane.b32.xlu2 %v2541_v20, %s2800_s4 }
 0x917   :  { %1430 = vrot.lane.b32.xlu1 %v2547_v22, %s2800_s4  ;;  %1270 = vrot.lane.b32.xlu0 %v2541_v20, %s2165_s18  ;;  %s2804_s18 = smov 56  }
 0x91f   :  { %1404 = vrot.lane.b32.xlu0 %v2541_v20, %s2166_s19  ;;  %s2805_s19 = smov 8  }
 0x94a   :  { %v1010_v23 = vpop.permute.xlu2 %1009 }
 0x94b   :  { %1917 = vmatpush.xpose.msk.msra.mxu2 %vm163_vm8, %v1010_v23 }
 0x94e   :  { %1918 = vmatmul.msk.f32.vlgmr.msra.gmra.mxu2 %vm163_vm8, %v2541_v20 }
 0x952   :  { %v1141_v24 = vpop.permute.xlu2 %1140 }
 0x95a   :  { %v1299_v26 = vpop.permute.xlu2 %1298 }
 0x962   :  { %v1433_v57 = vpop.permute.xlu2 %1432 }
 0x96a   :  { %v1403_v33 = vpop.permute.xlu2 %1402 }
 0x971   :  { %v1169_v25 = vpop.permute.xlu1 %1168  ;;  %v1037_v47 = vpop.permute.xlu0 %1036 }
 0x972   :  { %1919 = vmatpush.xpose.msk.msra.mxu0 %vm163_vm8, %v1037_v47  ;;  %1925 = vmatpush.xpose.msk.msra.mxu3 %vm163_vm8, %v1169_v25 }
 0x975   :  { %1920 = vmatmul.msk.f32.vlgmr.msra.gmra.mxu0 %vm163_vm8, %v2547_v22 }
 0x976   :  { %1923 = vmatpush.xpose.msk.msrb.mxu0 %vm163_vm8, %v1141_v24 }
 0x979   :  { %v1139_v27 = vpop.permute.xlu1 %1138  ;;  %v1167_v28 = vpop.permute.xlu0 %1166 }
 0x97a   :  { %1926 = vmatmul.msk.f32.vlgmr.msra.gmra.mxu3 %vm163_vm8, %v1167_v28 }
 0x97d   :  { %1924 = vmatmul.msk.f32.vlgmr.msrb.gmra.mxu0 %vm163_vm8, %v1139_v27 }
 0x981   :  { %v1273_v52 = vpop.permute.xlu1 %1272  ;;  %v1301_v29 = vpop.permute.xlu0 %1300 }
 0x982   :  { %1929 = vmatpush.xpose.msk.msra.mxu0 %vm163_vm8, %v1273_v52  ;;  %1931 = vmatpush.xpose.msk.msrb.mxu3 %vm163_vm8, %v1301_v29 }
 0x985   :  { %1932 = vmatmul.msk.f32.vlgmr.msrb.gmra.mxu3 %vm163_vm8, %v1299_v26 }
 0x986   :  { %1937 = vmatpush.xpose.msk.msra.mxu3 %vm163_vm8, %v1433_v57 }
 0x989   :  { %v1271_v30 = vpop.permute.xlu0 %1270  ;;  %v1431_v31 = vpop.permute.xlu1 %1430 }
 0x98a   :  { %1930 = vmatmul.msk.f32.vlgmr.msra.gmra.mxu0 %vm163_vm8, %v1271_v30 }
 0x98d   :  { %1938 = vmatmul.msk.f32.vlgmr.msra.gmra.mxu3 %vm163_vm8, %v1431_v31 }
 0x991   :  { %v1405_v32 = vpop.permute.xlu0 %1404 }
 0x992   :  { %1935 = vmatpush.xpose.msk.msrb.mxu0 %vm163_vm8, %v1405_v32 }
 0x995   :  { %1936 = vmatmul.msk.f32.vlgmr.msrb.gmra.mxu0 %vm163_vm8, %v1403_v33 }
 0x9d1   :  { %v1032_v34 = vpop.f32.mrf.mxu2 }
 0x9d2   :  { %v1062_v35 = vmul.f32 0.35355338, %v1032_v34 }
 0x9d4   :  { %v1064_v36 = vsel %vm163_vm8, %v1062_v35, -inf }
 0x9d5   :  { %1065 = vmax.xlane.f32.xlu1 %v1064_v36 }
 0x9f2   :  { %v1059_v37 = vpop.f32.mrf.mxu0 }
 0x9f3   :  { %v1063_v38 = vmul.f32 0.35355338, %v1059_v37 }
 0x9f5   :  { %v1067_v39 = vsel %vm163_vm8, %v1063_v38, -inf }
 0x9f6   :  { %1068 = vmax.xlane.f32.xlu0 %v1067_v39 }
 0x9fa   :  { %v1163_v41 = vpop.f32.mrf.mxu0 }
 0x9fb   :  { %v1194_v40 = vmul.f32 0.35355338, %v1163_v41 }
 0x9fd   :  { %v1191_v42 = vpop.f32.mrf.mxu3  ;;  %v1196_v43 = vsel %vm163_vm8, %v1194_v40, -inf }
 0x9fe   :  { %v1195_v44 = vmul.f32 0.35355338, %v1191_v42  ;;  %1197 = vmax.xlane.f32.xlu2 %v1196_v43 }
 0xa00   :  { %v1199_v45 = vsel %vm163_vm8, %v1195_v44, -inf }
 0xa01   :  { %1200 = vmax.xlane.f32.xlu1 %v1199_v45 }
 0xa07   :  { %v1295_v46 = vpop.f32.mrf.mxu0 }
 0xa08   :  { %v1326_v48 = vmul.f32 0.35355338, %v1295_v46  ;;  %v1323_v49 = vpop.f32.mrf.mxu3 }
 0xa09   :  { %v1327_v50 = vmul.f32 0.35355338, %v1323_v49 }
 0xa0a   :  { %v1328_v51 = vsel %vm163_vm8, %v1326_v48, -inf }
 0xa0b   :  { %1329 = vmax.xlane.f32.xlu0 %v1328_v51  ;;  %v1331_v53 = vsel %vm163_vm8, %v1327_v50, -inf }
 0xa0c   :  { %1332 = vmax.xlane.f32.xlu2 %v1331_v53 }
 0xa10   :  { %v1455_v54 = vpop.f32.mrf.mxu3 }
 0xa11   :  { %v2597_v56 = vmul.f32 0.35355338, %v1455_v54 }
 0xa12   :  { %v1427_v58 = vpop.f32.mrf.mxu0 }
 0xa13   :  { %v1458_v59 = vmul.f32 0.35355338, %v1427_v58  ;;  %v1463_v60 = vsel %vm163_vm8, %v2597_v56, -inf }
 0xa14   :  { %1464 = vmax.xlane.f32.xlu0 %v1463_v60 }
 0xa15   :  { %v1460_v61 = vsel %vm163_vm8, %v1458_v59, -inf }
 0xa16   :  { %1461 = vmax.xlane.f32.xlu1 %v1460_v61 }
 0xa24   :  { %1998 = vrot.lane.b32.xlu2 %v1997_v62, %s2801_s28 }
 0xa48   :  { %v1066_v63 = vpop.xlane.xlu1 %1065 }
 0xa49   :  { %v1070_v0 = vsub.f32 %v1062_v35, %v1066_v63 }
 0xa4b   :  { %v1072_v1 = vmul.f32 1.442695, %v1070_v0 }
 0xa4d   :  { %2086 = vpow2.f32 %v1072_v1 }
 0xa53   :  { %v2605_v2 = vpop.eup %2086 }
 0xa54   :  { %v1076_v3 = vsel %vm163_vm8, %v2605_v2, 0.0 }
 0xa55   :  { %1077 = vadd.xlane.f32.xlu2 %v1076_v3 }
 0xa69   :  { %v1069_v4 = vpop.xlane.xlu0 %1068 }
 0xa6a   :  { %v1071_v5 = vsub.f32 %v1063_v38, %v1069_v4 }
 0xa6c   :  { %v1074_v6 = vmul.f32 1.442695, %v1071_v5 }
 0xa6d   :  { %2008 = vrot.lane.b32.xlu2 %v1997_v62, %s2802_s29 }
 0xa6e   :  { %2088 = vpow2.f32 %v1074_v6 }
 0xa71   :  { %v1198_v7 = vpop.xlane.xlu2 %1197 }
 0xa72   :  { %v1202_v8 = vsub.f32 %v1194_v40, %v1198_v7 }
 0xa74   :  { %v2089_v11 = vpop.eup %2088  ;;  %v1204_v12 = vmul.f32 1.442695, %v1202_v8  ;;  %v1201_v13 = vpop.xlane.xlu1 %1200 }
 0xa75   :  { %v1203_v14 = vsub.f32 %v1195_v44, %v1201_v13  ;;  %2013 = vrot.lane.b32.xlu2 %v1997_v62, %s2803_s0  ;;  %v1079_v55 = vsel %vm163_vm8, %v2089_v11, 0.0 }
 0xa76   :  { %2090 = vpow2.f32 %v1204_v12  ;;  %1080 = vadd.xlane.f32.xlu1 %v1079_v55 }
 0xa77   :  { %v1206_v15 = vmul.f32 1.442695, %v1203_v14 }
 0xa79   :  { %2092 = vpow2.f32 %v1206_v15 }
 0xa7c   :  { %v2612_v16 = vpop.eup %2090 }
 0xa7d   :  { %v1208_v18 = vsel %vm163_vm8, %v2612_v16, 0.0 }
 0xa7e   :  { %1209 = vadd.xlane.f32.xlu0 %v1208_v18  ;;  %v1330_v20 = vpop.xlane.xlu0 %1329 }
 0xa7f   :  { %v2616_v19 = vpop.eup %2092  ;;  %v1333_v21 = vpop.xlane.xlu2 %1332  ;;  %v1334_v24 = vsub.f32 %v1326_v48, %v1330_v20 }
 0xa80   :  { %v1335_v22 = vsub.f32 %v1327_v50, %v1333_v21  ;;  %v1211_v23 = vsel %vm163_vm8, %v2616_v19, 0.0 }
 0xa81   :  { %1212 = vadd.xlane.f32.xlu1 %v1211_v23  ;;  %v1336_v47 = vmul.f32 1.442695, %v1334_v24  ;;  %v1944_v24 = vld [vmem:[%s2770_s5 + $0x38] sm:$0xff] }
 0xa82   :  { %v1338_v25 = vmul.f32 1.442695, %v1335_v22  ;;  %1592 = vmatpush.msra.mxu0 %v1944_v24 }
 0xa84   :  { %2094 = vpow2.f32 %v1338_v25  ;;  %v1943_v25 = vld [vmem:[%s2770_s5 + $0x30] sm:$0xff] }
 0xa85   :  { %2096 = vpow2.f32 %v1336_v47  ;;  %v1942_v47 = vld [vmem:[%s2770_s5 + $0x28] sm:$0xff]  ;;  %1593 = vmatpush.msra.mxu0 %v1943_v25 }
 0xa87   :  { %v1999_v26 = vpop.permute.xlu2 %1998  ;;  %v1465_v32 = vpop.xlane.xlu0 %1464  ;;  %1594 = vmatpush.msra.mxu0 %v1942_v47 }
 0xa88   :  { %v2001_v27 = vunpack.i.h.bf16 %v1999_v26  ;;  %v2000_v28 = vunpack.i.l.bf16 %v1999_v26  ;;  %v1467_v34 = vsub.f32 %v2597_v56, %v1465_v32  ;;  %v1941_v26 = vld [vmem:[%s2770_s5 + $0x20] sm:$0xff]  ;;  %s1869_s5 = sshll.u32 %s2782_s17, 4  ;;  %s1870_s5 = int_to_ptr.hbm [resolvable:$true] %s1869_s5 }
 0xa89   :  { %v1462_v52 = vpop.xlane.xlu1 %1461  ;;  %1595 = vmatpush.msra.mxu0 %v1941_v26 }
 0xa8a   :  { %v2620_v29 = vpop.eup %2094  ;;  %v1466_v57 = vsub.f32 %v1458_v59, %v1462_v52  ;;  %1107 = vmatpush.msrb.mxu1 %v2000_v28  ;;  %1133 = vmatpush.msrb.mxu2 %v2001_v27  ;;  %v1470_v36 = vmul.f32 1.442695, %v1467_v34 }
 0xa8b   :  { %v1343_v30 = vsel %vm163_vm8, %v2620_v29, 0.0  ;;  %v2097_v33 = vpop.eup %2096 }
 0xa8c   :  { %1344 = vadd.xlane.f32.xlu0 %v1343_v30  ;;  %v1468_v31 = vmul.f32 1.442695, %v1466_v57  ;;  %v1340_v35 = vsel %vm163_vm8, %v2097_v33, 0.0 }
 0xa8e   :  { %2098 = vpow2.f32 %v1468_v31 }
 0xa8f   :  { %2100 = vpow2.f32 %v1470_v36 }
 0xa94   :  { %1341 = vadd.xlane.f32.xlu0 %v1340_v35  ;;  %v2099_v37 = vpop.eup %2098 }
 0xa95   :  { %v1472_v38 = vsel %vm163_vm8, %v2099_v37, 0.0  ;;  %v2101_v39 = vpop.eup %2100 }
 0xa96   :  { %v1475_v41 = vsel %vm163_vm8, %v2101_v39, 0.0 }
 0xa9a   :  { %2003 = vrot.lane.b32.xlu1 %v1997_v62, %s2804_s18 }
 0xa9c   :  { %1473 = vadd.xlane.f32.xlu0 %v1472_v38 }
 0xaa4   :  { %1476 = vadd.xlane.f32.xlu0 %v1475_v41 }
 0xac8   :  { %v1078_v40 = vpop.xlane.xlu2 %1077 }
 0xac9   :  { %2102 = vrcp.f32 %v1078_v40 }
 0xacf   :  { %v2103_v42 = vpop.eup %2102 }
 0xad0   :  { %v1084_v43 = vmul.f32 %v2103_v42, %v2605_v2  ;;  %v2009_v51 = vpop.permute.xlu2 %2008 }
 0xad1   :  { %v2011_v0 = vunpack.i.h.bf16 %v2009_v51  ;;  %v2010_v1 = vunpack.i.l.bf16 %v2009_v51 }
 0xad2   :  { %1921 = vmatmul.msk.f32.vlgmr.msrb.gmra.mxu1 %vm163_vm8, %v1084_v43 }
 0xad8   :  { %v2014_v59 = vpop.permute.xlu2 %2013 }
 0xad9   :  { %v2016_v3 = vunpack.i.h.bf16 %v2014_v59  ;;  %v2015_v4 = vunpack.i.l.bf16 %v2014_v59  ;;  %v1952_v59 = vld [vmem:[%s2774_s9 + $0x30] sm:$0xff] }
 0xae9   :  { %v1081_v44 = vpop.xlane.xlu1 %1080 }
 0xaea   :  { %2104 = vrcp.f32 %v1081_v44 }
 0xaf0   :  { %v2105_v45 = vpop.eup %2104 }
 0xaf1   :  { %v1085_v46 = vmul.f32 %v2105_v45, %v2089_v11  ;;  %v1210_v48 = vpop.xlane.xlu0 %1209 }
 0xaf2   :  { %2106 = vrcp.f32 %v1210_v48 }
 0xaf3   :  { %1922 = vmatmul.msk.f32.vlgmr.msrb.gmra.mxu2 %vm163_vm8, %v1085_v46 }
 0xaf4   :  { %v1213_v50 = vpop.xlane.xlu1 %1212 }
 0xaf5   :  { %2108 = vrcp.f32 %v1213_v50 }
 0xaf8   :  { %v2107_v54 = vpop.eup %2106 }
 0xaf9   :  { %v1216_v62 = vmul.f32 %v2107_v54, %v2612_v16 }
 0xafb   :  { %v2109_v56 = vpop.eup %2108 }
 0xafc   :  { %v1217_v63 = vmul.f32 %v2109_v56, %v2616_v19 }
 0xaff   :  { %v1345_v49 = vpop.xlane.xlu0 %1344 }
 0xb00   :  { %2110 = vrcp.f32 %v1345_v49 }
 0xb06   :  { %v2111_v5 = vpop.eup %2110 }
 0xb07   :  { %v1342_v53 = vpop.xlane.xlu0 %1341  ;;  %v1349_v7 = vmul.f32 %v2111_v5, %v2620_v29 }
 0xb08   :  { %2112 = vrcp.f32 %v1342_v53 }
 0xb0c   :  { %v2004_v58 = vpop.permute.xlu1 %2003 }
 0xb0d   :  { %v2006_v60 = vunpack.i.h.bf16 %v2004_v58  ;;  %v2005_v61 = vunpack.i.l.bf16 %v2004_v58 }
 0xb0e   :  { %v2113_v6 = vpop.eup %2112 }
 0xb0f   :  { %1239 = vmatpush.msra.mxu1 %v2005_v61  ;;  %1265 = vmatpush.msra.mxu2 %v2006_v60  ;;  %v1474_v2 = vpop.xlane.xlu0 %1473  ;;  %v1348_v8 = vmul.f32 %v2113_v6, %v2097_v33  ;;  %v1951_v60 = vld [vmem:[%s2774_s9 + $0x28] sm:$0xff]  ;;  %v1950_v61 = vld [vmem:[%s2774_s9 + $0x20] sm:$0xff] }
 0xb10   :  { %1927 = vmatmul.msk.f32.vlgmr.msra.gmra.mxu1 %vm163_vm8, %v1216_v62  ;;  %1928 = vmatmul.msk.f32.vlgmr.msra.gmra.mxu2 %vm163_vm8, %v1217_v63  ;;  %2114 = vrcp.f32 %v1474_v2 }
 0xb11   :  { %1371 = vmatpush.msrb.mxu1 %v2010_v1  ;;  %1397 = vmatpush.msrb.mxu2 %v2011_v0 }
 0xb13   :  { %1503 = vmatpush.msra.mxu1 %v2015_v4  ;;  %1529 = vmatpush.msra.mxu2 %v2016_v3 }
 0xb16   :  { %v2115_v12 = vpop.eup %2114 }
 0xb17   :  { %v1477_v11 = vpop.xlane.xlu0 %1476  ;;  %v1480_v14 = vmul.f32 %v2115_v12, %v2099_v37  ;;  %v2028_v37 = vld [vmem:[%s2771_s6 + $0x1] ss:$0 sm:$0xff] }
 0xb18   :  { %2116 = vrcp.f32 %v1477_v11  ;;  %1933 = vmatmul.msk.f32.vlgmr.msrb.gmra.mxu1 %vm163_vm8, %v1348_v8  ;;  %1934 = vmatmul.msk.f32.vlgmr.msrb.gmra.mxu2 %vm163_vm8, %v1349_v7  ;;  %v2029_v12 = vld [vmem:[%s2772_s7 + $0x1] ss:$0 sm:$0xff] }
 0xb1e   :  { %v2117_v13 = vpop.eup %2116 }
 0xb1f   :  { %v1481_v55 = vmul.f32 %v2117_v13, %v2101_v39 }
 0xb20   :  { %1939 = vmatmul.msk.f32.vlgmr.msra.gmra.mxu1 %vm163_vm8, %v1480_v14 }
 0xb21   :  { %1940 = vmatmul.msk.f32.vlgmr.msra.gmra.mxu2 %vm163_vm8, %v1481_v55  ;;  %v2030_v55 = vld [vmem:[%s2773_s8 + $0x1] ss:$0 sm:$0xff] }
 0xb4f   :  { %v1109_v15 = vpop.f32.mrf.mxu1 }
 0xb76   :  { %v1135_v16 = vpop.f32.mrf.mxu2 }
 0xb8d   :  { %v1241_v18 = vpop.f32.mrf.mxu1 }
 0xb8e   :  { %1536 = vrot.lane.b32.xlu0 %v1241_v18, %s2805_s19 }
 0xb93   :  { %v1267_v19 = vpop.f32.mrf.mxu2 }
 0xb95   :  { %v1373_v20 = vpop.f32.mrf.mxu1 }
 0xb96   :  { %1544 = vrot.lane.b32.xlu1 %v1373_v20, %s2806_s1 }
 0xb9b   :  { %v1399_v21 = vpop.f32.mrf.mxu2 }
 0xb9d   :  { %v1505_v22 = vpop.f32.mrf.mxu1 }
 0xb9e   :  { %1538 = vrot.lane.b32.xlu1 %v1267_v19, %s2805_s19  ;;  %1552 = vrot.lane.b32.xlu2 %v1505_v22, %s2807_s20 }
 0xba4   :  { %v1531_v23 = vpop.f32.mrf.mxu2 }
 0xba6   :  { %1546 = vrot.lane.b32.xlu2 %v1399_v21, %s2806_s1  ;;  %1554 = vrot.lane.b32.xlu1 %v1531_v23, %s2807_s20 }
 0xbf8   :  { %v1553_v29 = vpop.permute.xlu2 %1552 }
 0xc00   :  { %v1537_v27 = vpop.permute.xlu0 %1536  ;;  %v1547_v33 = vpop.permute.xlu2 %1546 }
 0xc01   :  { %v1558_v28 = vsel %vm163_vm8, %v1109_v15, %v1537_v27  ;;  %v1964_v27 = vld [vmem:[%s2776_s11 + $0x78] sm:$0xff] }
 0xc02   :  { %1748 = vmatpush.msrb.mxu1 %v1964_v27 }
 0xc08   :  { %v1545_v52 = vpop.permute.xlu1 %1544 }
 0xc09   :  { %v1560_v57 = vsel %vm713_vm9, %v1558_v28, %v1545_v52  ;;  %v1963_v28 = vld [vmem:[%s2776_s11 + $0x70] sm:$0xff]  ;;  %v1962_v52 = vld [vmem:[%s2776_s11 + $0x68] sm:$0xff] }
 0xc0a   :  { %v1562_v30 = vsel %vm716_vm10, %v1560_v57, %v1553_v29  ;;  %1749 = vmatpush.msrb.mxu1 %v1963_v28  ;;  %v1961_v29 = vld [vmem:[%s2776_s11 + $0x60] sm:$0xff]  ;;  %v1960_v57 = vld [vmem:[%s2776_s11 + $0x58] sm:$0xff] }
 0xc0b   :  { %1946 = vmatmul.msk.f32.vlgmr.msra.gmra.mxu0 %vm61_vm0, %v1562_v30  ;;  %v1959_v30 = vld [vmem:[%s2776_s11 + $0x50] sm:$0xff] }
 0xc0c   :  { %1750 = vmatpush.msrb.mxu1 %v1962_v52 }
 0xc0e   :  { %1751 = vmatpush.msrb.mxu1 %v1961_v29 }
 0xc10   :  { %v1539_v31 = vpop.permute.xlu1 %1538  ;;  %1752 = vmatpush.msrb.mxu1 %v1960_v57 }
 0xc11   :  { %v1559_v32 = vsel %vm163_vm8, %v1135_v16, %v1539_v31  ;;  %v1958_v31 = vld [vmem:[%s2776_s11 + $0x48] sm:$0xff] }
 0xc12   :  { %v1561_v35 = vsel %vm713_vm9, %v1559_v32, %v1547_v33  ;;  %1753 = vmatpush.msrb.mxu1 %v1959_v30  ;;  %v1957_v32 = vld [vmem:[%s2776_s11 + $0x40] sm:$0xff] }
 0xc13   :  { %v2031_v33 = vld [vmem:[%s2775_s10 + $0x1] ss:$0 sm:$0xff] }
 0xc14   :  { %1754 = vmatpush.msrb.mxu1 %v1958_v31 }
 0xc16   :  { %1755 = vmatpush.msrb.mxu1 %v1957_v32 }
 0xc18   :  { %v1555_v34 = vpop.permute.xlu1 %1554 }
 0xc19   :  { %v1563_v36 = vsel %vm716_vm10, %v1561_v35, %v1555_v34 }
 0xc1a   :  { %1947 = vmatmul.msk.f32.gmra.mxu0 %vm61_vm0, %v1563_v36 }
 0xc88   :  { %v1597_v38 = vpop.f32.mrf.mxu0 }
 0xc89   :  { %v1598_v39 = vadd.f32 %v2028_v37, %v1597_v38 }
 0xc8b   :  { %v1603_v41 = vadd.f32 %v1598_v39, %v2530_v9 }
 0xc8d   :  { %v1609_v40 = vsel %vm61_vm0, %v1603_v41, 0.0 }
 0xc8e   :  { %1610 = vadd.xlane.f32.xlu2 %v1609_v40 }
 0xc97   :  { %v1600_v42 = vpop.f32.mrf.mxu0 }
 0xc98   :  { %v1601_v43 = vadd.f32 %v2028_v37, %v1600_v42 }
 0xc9a   :  { %v1604_v44 = vadd.f32 %v1601_v43, %v2534_v17  ;;  %v1953_v17 = vld [vmem:[%s2774_s9 + $0x38] sm:$0xff] }
 0xc9b   :  { %1691 = vmatpush.msrb.mxu3 %v1953_v17  ;;  %v2032_v17 = vld [vmem:[%s2777_s12 + $0x1] ss:$0 sm:$0xff] }
 0xc9c   :  { %v1612_v45 = vsel %vm61_vm0, %v1604_v44, 0.0 }
 0xc9d   :  { %1613 = vadd.xlane.f32.xlu0 %v1612_v45  ;;  %1692 = vmatpush.msrb.mxu3 %v1952_v59 }
 0xc9f   :  { %1693 = vmatpush.msrb.mxu3 %v1951_v60 }
 0xca1   :  { %1694 = vmatpush.msrb.mxu3 %v1950_v61 }
 0xd01   :  { %v1611_v46 = vpop.xlane.xlu2 %1610 }
 0xd02   :  { %v1615_v48 = vmul.f32 %v1611_v46, %v2274_v10 }
 0xd04   :  { %v1617_v49 = vsub.f32 %v1603_v41, %v1615_v48 }
 0xd06   :  { %v1619_v50 = vmul.f32 %v1617_v49, %v1617_v49 }
 0xd08   :  { %v1621_v51 = vsel %vm61_vm0, %v1619_v50, 0.0 }
 0xd09   :  { %1622 = vadd.xlane.f32.xlu1 %v1621_v51 }
 0xd10   :  { %v1614_v53 = vpop.xlane.xlu0 %1613 }
 0xd11   :  { %v1616_v9 = vmul.f32 %v1614_v53, %v2274_v10 }
 0xd13   :  { %v1618_v54 = vsub.f32 %v1604_v44, %v1616_v9 }
 0xd15   :  { %v1620_v56 = vmul.f32 %v1618_v54, %v1618_v54 }
 0xd17   :  { %v1624_v58 = vsel %vm61_vm0, %v1620_v56, 0.0 }
 0xd18   :  { %1625 = vadd.xlane.f32.xlu2 %v1624_v58 }
 0xd7c   :  { %v1623_v62 = vpop.xlane.xlu1 %1622 }
 0xd7d   :  { %v1627_v63 = vmul.f32 %v1623_v62, %v2274_v10 }
 0xd7f   :  { %v1629_v0 = vadd.f32 1e-12, %v1627_v63 }
 0xd81   :  { %2118 = vrsqrt.f32 %v1629_v0  ;;  %vm1637_vm9 = vweird.f32 %v1629_v0 }
 0xd87   :  { %v2119_v1 = vpop.eup %2118 }
 0xd88   :  { %v1632_v2 = vmul.f32 %v2119_v1, %v1629_v0  ;;  %vm1638_vm8 = vweird.f32 %v2119_v1 }
 0xd89   :  { %vm1639_vm10 = vmor %vm1637_vm9, %vm1638_vm8 }
 0xd8a   :  { %v1633_v3 = vmul.f32 %v2119_v1, %v1632_v2 }
 0xd8b   :  { %v1626_v4 = vpop.xlane.xlu2 %1625 }
 0xd8c   :  { %v1634_v5 = vmul.f32 0.5, %v1633_v3  ;;  %v1628_v6 = vmul.f32 %v1626_v4, %v2274_v10 }
 0xd8e   :  { %v1635_v7 = vsub.f32 1.5, %v1634_v5  ;;  %v1630_v8 = vadd.f32 1e-12, %v1628_v6 }
 0xd90   :  { %v1636_v11 = vmul.f32 %v2119_v1, %v1635_v7  ;;  %2120 = vrsqrt.f32 %v1630_v8  ;;  %vm1647_vm13 = vweird.f32 %v1630_v8 }
 0xd92   :  { %v1640_v13 = vsel %vm1639_vm10, %v2119_v1, %v1636_v11 }
 0xd93   :  { %v1651_v14 = vmul.f32 %v1640_v13, %v1617_v49 }
 0xd95   :  { %v1656_v15 = vmul.f32 %v2029_v12, %v1651_v14 }
 0xd96   :  { %v2121_v16 = vpop.eup %2120 }
 0xd97   :  { %v1642_v18 = vmul.f32 %v2121_v16, %v1630_v8  ;;  %v1661_v19 = vadd.f32 %v2030_v55, %v1656_v15  ;;  %vm1648_vm12 = vweird.f32 %v2121_v16 }
 0xd98   :  { %vm1649_vm14 = vmor %vm1647_vm13, %vm1648_vm12 }
 0xd99   :  { %v1643_v20 = vmul.f32 %v2121_v16, %v1642_v18  ;;  %1955 = vmatmul.msk.f32.vlgmr.msrb.gmra.mxu3 %vm61_vm0, %v1661_v19  ;;  %v1828_v18 = vld [vmem:[%s2780_s15 + $0x18] sm:$0xff] }
 0xd9a   :  { %1852 = vmatpush.msrb.mxu2 %v1828_v18 }
 0xd9b   :  { %v1644_v21 = vmul.f32 0.5, %v1643_v20  ;;  %v1826_v20 = vld [vmem:[%s2780_s15 + $0x8] sm:$0xff] }
 0xd9d   :  { %v1645_v22 = vsub.f32 1.5, %v1644_v21 }
 0xd9f   :  { %v1646_v23 = vmul.f32 %v2121_v16, %v1645_v22 }
 0xda1   :  { %v1650_v24 = vsel %vm1649_vm14, %v2121_v16, %v1646_v23  ;;  %v1825_v23 = vld [vmem:[%s2780_s15] sm:$0xff] }
 0xda2   :  { %v1652_v25 = vmul.f32 %v1650_v24, %v1618_v54 }
 0xda4   :  { %v1657_v47 = vmul.f32 %v2029_v12, %v1652_v25 }
 0xda6   :  { %v1662_v26 = vadd.f32 %v2030_v55, %v1657_v47 }
 0xda8   :  { %1956 = vmatmul.msk.f32.gmra.mxu3 %vm61_vm0, %v1662_v26 }
 0xe1c   :  { %v1696_v34 = vpop.f32.mrf.mxu3 }
 0xe1d   :  { %v1697_v35 = vadd.f32 %v2031_v33, %v1696_v34  ;;  %v2033_v34 = vld [vmem:[%s2778_s13 + $0x1] ss:$0 sm:$0xff] }
 0xe1f   :  { %v1704_v36 = vmul.f32 0.044715, %v1697_v35  ;;  %v1702_v45 = vmul.f32 0.5, %v1697_v35 }
 0xe21   :  { %v1706_v37 = vmul.f32 %v1704_v36, %v1697_v35 }
 0xe23   :  { %v1708_v38 = vmul.f32 %v1706_v37, %v1697_v35  ;;  %v2034_v37 = vld [vmem:[%s2779_s14 + $0x1] ss:$0 sm:$0xff]  ;;  %s1867_s14 = sshll.u32 %s2175_s25, 4  ;;  %s1868_s14 = int_to_ptr.vmem [resolvable:$true] %s1867_s14 }
 0xe25   :  { %v1710_v39 = vadd.f32 %v1708_v38, %v1697_v35 }
 0xe27   :  { %v1712_v41 = vmul.f32 0.7978846, %v1710_v39 }
 0xe29   :  { %2122 = vtanh.f32 %v1712_v41 }
 0xe2b   :  { %v1699_v40 = vpop.f32.mrf.mxu3 }
 0xe2c   :  { %v1700_v42 = vadd.f32 %v2031_v33, %v1699_v40 }
 0xe2e   :  { %v1705_v43 = vmul.f32 0.044715, %v1700_v42  ;;  %v1703_v54 = vmul.f32 0.5, %v1700_v42 }
 0xe2f   :  { %v2123_v44 = vpop.eup %2122 }
 0xe30   :  { %v1716_v46 = vadd.f32 1.0, %v2123_v44  ;;  %v1707_v48 = vmul.f32 %v1705_v43, %v1700_v42 }
 0xe32   :  { %v1718_v49 = vmul.f32 %v1716_v46, %v1702_v45  ;;  %v1709_v50 = vmul.f32 %v1707_v48, %v1700_v42  ;;  %v2035_v48 = vld [vmem:[%s2781_s16] ss:$0 sm:$0xff] }
 0xe34   :  { %1966 = vmatmul.msk.f32.vlgmr.msrb.gmra.mxu1 %vm881_vm2, %v1718_v49  ;;  %v1711_v51 = vadd.f32 %v1709_v50, %v1700_v42 }
 0xe36   :  { %v1713_v53 = vmul.f32 0.7978846, %v1711_v51 }
 0xe38   :  { %2124 = vtanh.f32 %v1713_v53 }
 0xe3e   :  { %v2125_v9 = vpop.eup %2124 }
 0xe3f   :  { %v1717_v56 = vadd.f32 1.0, %v2125_v9 }
 0xe41   :  { %v1719_v58 = vmul.f32 %v1717_v56, %v1703_v54 }
 0xe43   :  { %1967 = vmatmul.msk.f32.gmra.mxu1 %vm881_vm2, %v1719_v58 }
 0xeb1   :  { %v1757_v59 = vpop.f32.mrf.mxu1 }
 0xeb2   :  { %v1758_v60 = vadd.f32 %v2032_v17, %v1757_v59 }
 0xeb4   :  { %v1763_v61 = vadd.f32 %v1758_v60, %v1661_v19  ;;  %v1827_v19 = vld [vmem:[%s2780_s15 + $0x10] sm:$0xff] }
 0xeb5   :  { %1853 = vmatpush.msrb.mxu2 %v1827_v19 }
 0xeb6   :  { %v1769_v62 = vsel %vm61_vm0, %v1763_v61, 0.0 }
 0xeb7   :  { %1770 = vadd.xlane.f32.xlu1 %v1769_v62  ;;  %1854 = vmatpush.msrb.mxu2 %v1826_v20 }
 0xeb9   :  { %1855 = vmatpush.msrb.mxu2 %v1825_v23 }
 0xec0   :  { %v1760_v63 = vpop.f32.mrf.mxu1 }
 0xec1   :  { %v1761_v0 = vadd.f32 %v2032_v17, %v1760_v63 }
 0xec3   :  { %v1764_v1 = vadd.f32 %v1761_v0, %v1662_v26 }
 0xec5   :  { %v1772_v2 = vsel %vm61_vm0, %v1764_v1, 0.0 }
 0xec6   :  { %1773 = vadd.xlane.f32.xlu0 %v1772_v2 }
 0xf2a   :  { %v1771_v3 = vpop.xlane.xlu1 %1770 }
 0xf2b   :  { %v1775_v4 = vmul.f32 %v1771_v3, %v2274_v10 }
 0xf2d   :  { %v1777_v5 = vsub.f32 %v1763_v61, %v1775_v4 }
 0xf2f   :  { %v1779_v6 = vmul.f32 %v1777_v5, %v1777_v5 }
 0xf31   :  { %v1781_v7 = vsel %vm61_vm0, %v1779_v6, 0.0 }
 0xf32   :  { %1782 = vadd.xlane.f32.xlu0 %v1781_v7 }
 0xf39   :  { %v1774_v8 = vpop.xlane.xlu0 %1773 }
 0xf3a   :  { %v1776_v11 = vmul.f32 %v1774_v8, %v2274_v10 }
 0xf3c   :  { %v1778_v12 = vsub.f32 %v1764_v1, %v1776_v11 }
 0xf3e   :  { %v1780_v13 = vmul.f32 %v1778_v12, %v1778_v12 }
 0xf40   :  { %v1784_v14 = vsel %vm61_vm0, %v1780_v13, 0.0 }
 0xf41   :  { %1785 = vadd.xlane.f32.xlu2 %v1784_v14 }
 0xfa5   :  { %v1783_v55 = vpop.xlane.xlu0 %1782 }
 0xfa6   :  { %v1787_v15 = vmul.f32 %v1783_v55, %v2274_v10 }
 0xfa8   :  { %v1789_v16 = vadd.f32 1e-12, %v1787_v15 }
 0xfaa   :  { %2126 = vrsqrt.f32 %v1789_v16  ;;  %vm1797_vm1 = vweird.f32 %v1789_v16 }
 0xfb0   :  { %v2127_v21 = vpop.eup %2126 }
 0xfb1   :  { %v1792_v22 = vmul.f32 %v2127_v21, %v1789_v16  ;;  %vm1798_vm15 = vweird.f32 %v2127_v21 }
 0xfb2   :  { %vm1799_vm2 = vmor %vm1797_vm1, %vm1798_vm15 }
 0xfb3   :  { %v1793_v24 = vmul.f32 %v2127_v21, %v1792_v22 }
 0xfb4   :  { %v1786_v25 = vpop.xlane.xlu2 %1785 }
 0xfb5   :  { %v1788_v47 = vmul.f32 %v1786_v25, %v2274_v10  ;;  %v1794_v27 = vmul.f32 0.5, %v1793_v24 }
 0xfb7   :  { %v1790_v26 = vadd.f32 1e-12, %v1788_v47  ;;  %v1795_v28 = vsub.f32 1.5, %v1794_v27 }
 0xfb9   :  { %2128 = vrsqrt.f32 %v1790_v26  ;;  %v1796_v29 = vmul.f32 %v2127_v21, %v1795_v28  ;;  %vm1807_vm4 = vweird.f32 %v1790_v26 }
 0xfbb   :  { %v1800_v31 = vsel %vm1799_vm2, %v2127_v21, %v1796_v29 }
 0xfbc   :  { %v1811_v10 = vmul.f32 %v1800_v31, %v1777_v5 }
 0xfbe   :  { %v1816_v38 = vmul.f32 %v2033_v34, %v1811_v10 }
 0xfbf   :  { %v2129_v52 = vpop.eup %2128 }
 0xfc0   :  { %v1802_v57 = vmul.f32 %v2129_v52, %v1790_v26  ;;  %vm1808_vm3 = vweird.f32 %v2129_v52  ;;  %v1821_v40 = vadd.f32 %v2034_v37, %v1816_v38 }
 0xfc1   :  { %vm1809_vm5 = vmor %vm1807_vm4, %vm1808_vm3 }
 0xfc2   :  { %v1803_v30 = vmul.f32 %v2129_v52, %v1802_v57 }
 0xfc4   :  { %v1804_v32 = vmul.f32 0.5, %v1803_v30 }
 0xfc6   :  { %v1805_v33 = vsub.f32 1.5, %v1804_v32 }
 0xfc8   :  { %v1806_v35 = vmul.f32 %v2129_v52, %v1805_v33 }
 0xfca   :  { %v1810_v36 = vsel %vm1809_vm5, %v2129_v52, %v1806_v35 }
 0xfcb   :  { %v1812_v39 = vmul.f32 %v1810_v36, %v1778_v12 }
 0xfcd   :  { %v1817_v41 = vmul.f32 %v2033_v34, %v1812_v39 }
 0xfcf   :  { %v1822_v42 = vadd.f32 %v2034_v37, %v1817_v41 }
 0xfd1   :  { %2130 = vtanh.f32 %v1822_v42 }
 0xfd2   :  { %2132 = vtanh.f32 %v1821_v40 }
 0xfd7   :  { %v2131_v43 = vpop.eup %2130 }
 0xfd8   :  { %v1835_v44 = vrot.slane %v2131_v43, 7  ;;  %v2133_v45 = vpop.eup %2132 }
 0xfda   :  { %v1837_v46 = vsel %vm1836_vm6, %v1835_v44, %v2133_v45 }
 0xfdb   :  { %1970 = vmatmul.msk.f32.vlgmr.msrb.gmra.mxu2 %vm61_vm0, %v1837_v46 }
0x105e   :  { %v1857_v49 = vpop.f32.mrf.mxu2 }
0x105f   :  { %v1858_v50 = vadd.f32 %v2035_v48, %v1857_v49 }
0x1061   :  { %1861 = vst.msk [vmem:[#allocation2] sm:$0x3] %vm1860_vm7, %v1858_v50 }
0x1062   :  { %1872 = dma.vmem_to_hbm [thread:$0]  %s1868_s14, 32, %s1870_s5, [#allocation3]  }
0x1063   :  { %2158 = dma.done.wait [#allocation3], 32  }
0x1064   :  { %2159 = vsyncadd [#allocation3], 4294967264 }
0x1065   :  { %1877 = vsyncpa [#allocation3], 1 }

</bundles_post_ra>
